<compile_context>
chip_gen: v5e
topology: v5e:2x2
jax: 0.10.0
libtpu: 0.0.40
codegen_flags: <defaults>
</compile_context>

<pallas_src>
import math

import jax
import jax.numpy as jnp
from jax import lax
from jax.experimental import pallas as pl
from jax.experimental.pallas import tpu as pltpu


def _cq_attention_kernel(c_ref, q_ref, w_ref, qadd_ref, cadd_ref, bias_ref,
                         out_ref):
    # Per-batch tile (grid axis 0 is the batch).  Everything is channel-major.
    D = c_ref.shape[1]
    mxu_dtype = c_ref.dtype            # native input dtype drives MXU precision

    c_nat = c_ref[0]                   # (D, Lc)  native dtype (f32 or bf16)
    q_nat = q_ref[0]                   # (D, Lq)  native dtype
    w = w_ref[...]                     # (D, 3) f32 = [w4C | w4Q | w4mlu]
    w4c = w[:, 0:1]                    # (D, 1)
    w4q = w[:, 1:2]                    # (D, 1)
    w4mlu = w[:, 2:3]                  # (D, 1)
    qadd = qadd_ref[0]                 # (1, Lq) additive query mask (0 / -1e30)
    cadd = cadd_ref[0]                 # (Lc, 1) additive context mask (0 / -1e30)
    bias = bias_ref[0]                 # scalar (SMEM)

    c_f32 = c_nat.astype(jnp.float32)
    q_f32 = q_nat.astype(jnp.float32)

    # Pass-through slab stored early so its writeback overlaps the rest.
    out_ref[0, 0:D, :] = c_nat.astype(out_ref.dtype)

    # ---- trilinear_for_attention (dropout = identity in eval mode):
    #   S[i, j] = sum_d c[d,i] * (w4mlu[d]*q[d,j] + w4C[d])
    #           + sum_d q[d,j]*w4Q[d]  + bias
    r = (w4mlu * q_f32 + w4c).astype(mxu_dtype)                    # (D, Lq) VPU
    s = lax.dot_general(c_nat, r, (((0,), (0,)), ((), ())),
                        preferred_element_type=jnp.float32)        # (Lc, Lq) f32
    sub1 = jnp.sum(q_f32 * w4q, axis=0, keepdims=True)             # (1, Lq)
    s = s + (sub1 + bias)

    # ---- mask_logits as a single additive mask per element.
    s_q = s + qadd                                                 # (Lc, Lq)
    s_c = s + cadd                                                 # (Lc, Lq)

    # ---- S1 = softmax over query axis; S2 = softmax over context axis.
    # Exact division (not approx reciprocal): the kernel is memory-bound, and
    # the exact divide keeps a tight tolerance vs the PyTorch reference.
    m1 = jnp.max(s_q, axis=-1, keepdims=True)
    e1 = jnp.exp(s_q - m1)
    s1 = e1 / jnp.sum(e1, axis=-1, keepdims=True)                  # (Lc, Lq) f32

    m2 = jnp.max(s_c, axis=0, keepdims=True)
    e2 = jnp.exp(s_c - m2)
    s2 = e2 / jnp.sum(e2, axis=0, keepdims=True)                   # (Lc, Lq) f32

    s1_m = s1.astype(mxu_dtype)
    s2_m = s2.astype(mxu_dtype)

    # ---- Reassociated second product: B = S1 @ (S2^T @ C)
    #      natively: T = C_native @ S2 (D, Lq)
    t = jnp.dot(c_nat, s2_m, preferred_element_type=jnp.float32)   # (D, Lq) f32

    # ---- Fused Lq-contraction: [Q ; T] @ S1^T  -> [A ; B]  (fills MXU M=256)
    qt = jnp.concatenate(
        [q_nat.astype(mxu_dtype), t.astype(mxu_dtype)], axis=0)    # (2D, Lq)
    ab = lax.dot_general(qt, s1_m, (((1,), (1,)), ((), ())),
                         preferred_element_type=jnp.float32)       # (2D, Lc)
    a = ab[0:D, :]                                                 # (D, Lc)
    b = ab[D:2 * D, :]                                             # (D, Lc)

    # ---- out = cat([C, A, C*A, C*B], feature axis) stored as direct slabs.
    out_ref[0, D:2 * D, :] = a.astype(out_ref.dtype)
    out_ref[0, 2 * D:3 * D, :] = (c_f32 * a).astype(out_ref.dtype)
    out_ref[0, 3 * D:4 * D, :] = (c_f32 * b).astype(out_ref.dtype)


def _round_up(x, m):
    return ((x + m - 1) // m) * m


def cq_attention(C, Q, Cmask, Qmask, w4C, w4Q, w4mlu, bias, *, out_dtype=None):
    """C: (B, D, Lc), Q: (B, D, Lq), Cmask: (B, Lc), Qmask: (B, Lq).
    Returns (B, 4*D, Lc) in out_dtype (defaults to C.dtype), matching the
    PyTorch module's forward (eval mode)."""
    B, D, Lc = C.shape
    Lq = Q.shape[2]
    out_dtype = C.dtype if out_dtype is None else out_dtype

    # Pad the sequence axes to lane-dense multiples of 128 (biggest measured
    # lever for the (Lc,Lq) temporaries and the (4D, Lc) output stores).
    Lc_p = _round_up(Lc, 128)
    Lq_p = _round_up(Lq, 128)
    if Lc_p != Lc:
        C = jnp.pad(C, ((0, 0), (0, 0), (0, Lc_p - Lc)))
    if Lq_p != Lq:
        Q = jnp.pad(Q, ((0, 0), (0, 0), (0, Lq_p - Lq)))

    # Additive masks: 0 where valid, -1e30 where padded/invalid.  Padded
    # positions are marked invalid, so padding is numerically free.
    qv = jnp.pad(Qmask.astype(jnp.float32), ((0, 0), (0, Lq_p - Lq)))
    cv = jnp.pad(Cmask.astype(jnp.float32), ((0, 0), (0, Lc_p - Lc)))
    qadd = ((1.0 - qv) * (-1e30)).reshape(B, 1, Lq_p)        # lane-dense row
    cadd = ((1.0 - cv) * (-1e30)).reshape(B, Lc_p, 1)        # column mask
    # TODO(synk): cadd is a lane-sparse (Lc,1) block; a lane-dense (1,Lc) mask
    # expanded to a column in-kernel would shave a tiny amount of DMA.

    # One lane-compact weight block instead of three (D,1)/(1,1,D) blocks.
    w_stack = jnp.concatenate(
        [w4C.reshape(D, 1), w4Q.reshape(D, 1), w4mlu.reshape(D, 1)],
        axis=1).astype(jnp.float32)                          # (D, 3)
    bias_arr = jnp.reshape(bias, (1,)).astype(jnp.float32)   # (1,) -> SMEM

    isz = jnp.dtype(C.dtype).itemsize
    osz = jnp.dtype(out_dtype).itemsize

    # Advisory cost estimate for XLA scheduling around the custom call.
    flops = 8 * B * D * Lc_p * Lq_p                  # S, T, fused [A;B]
    transcendentals = 2 * B * Lc_p * Lq_p            # two exp passes
    bytes_accessed = int(B * D * (Lc_p + Lq_p) * isz          # C, Q
                         + B * (Lc_p + Lq_p) * 4              # masks
                         + D * 3 * 4 + 4                      # weights + bias
                         + B * 4 * D * Lc_p * osz)            # output

    # VMEM budgeting: raise the scoped limit only when the footprint demands
    # it (keeps defaults on small shapes; avoids over-asking on v7x's 64 MiB).
    vmem_est = (2 * D * (Lc_p + Lq_p) * isz          # double-buffered C, Q
                + 2 * 4 * D * Lc_p * osz             # double-buffered output
                + 12 * Lc_p * Lq_p * 4               # (Lc,Lq) f32 temporaries
                + 6 * D * max(Lc_p, Lq_p) * 4)       # r/t/ab temporaries
    cp_kwargs = dict(dimension_semantics=("parallel",))
    if vmem_est > 28 * (1 << 20):
        cp_kwargs["vmem_limit_bytes"] = int(min(vmem_est * 5 // 4, 120 << 20))
    # TODO(synk): for very long contexts on v7x (64 MiB VMEM), tile Lc into a
    # grid axis with an online context-axis softmax and split output slabs.

    out = pl.pallas_call(
        _cq_attention_kernel,
        out_shape=jax.ShapeDtypeStruct((B, 4 * D, Lc_p), out_dtype),
        grid=(B,),
        in_specs=[
            pl.BlockSpec((1, D, Lc_p), lambda i: (i, 0, 0)),
            pl.BlockSpec((1, D, Lq_p), lambda i: (i, 0, 0)),
            pl.BlockSpec((D, 3), lambda i: (0, 0)),
            pl.BlockSpec((1, 1, Lq_p), lambda i: (i, 0, 0)),
            pl.BlockSpec((1, Lc_p, 1), lambda i: (i, 0, 0)),
            pl.BlockSpec(memory_space=pltpu.MemorySpace.SMEM),
        ],
        out_specs=pl.BlockSpec((1, 4 * D, Lc_p), lambda i: (i, 0, 0)),
        compiler_params=pltpu.CompilerParams(**cp_kwargs),
        cost_estimate=pl.CostEstimate(flops=int(flops),
                                      transcendentals=int(transcendentals),
                                      bytes_accessed=bytes_accessed),
    )(C, Q, w_stack, qadd, cadd, bias_arr)

    if Lc_p != Lc:
        out = out[:, :, :Lc]
    return out                                               # (B, 4D, Lc)


# ---------------- pure-JAX reference (PyTorch math, for correctness) --------
def cq_attention_ref(C, Q, Cmask, Qmask, w4C, w4Q, w4mlu, bias):
    c = jnp.transpose(C, (0, 2, 1)).astype(jnp.float32)      # (B, Lc, D)
    q = jnp.transpose(Q, (0, 2, 1)).astype(jnp.float32)      # (B, Lq, D)
    B, Lc, D = c.shape
    Lq = q.shape[1]
    sub0 = c @ w4C                                           # (B, Lc, 1)
    sub1 = jnp.transpose(q @ w4Q, (0, 2, 1))                 # (B, 1, Lq)
    sub2 = (c * w4mlu.reshape(1, 1, D)) @ jnp.transpose(q, (0, 2, 1))
    S = sub0 + sub1 + sub2 + bias
    cm = Cmask.reshape(B, Lc, 1).astype(jnp.float32)
    qm = Qmask.reshape(B, 1, Lq).astype(jnp.float32)
    S1 = jax.nn.softmax(S * qm + (1 - qm) * (-1e30), axis=2)
    S2 = jax.nn.softmax(S * cm + (1 - cm) * (-1e30), axis=1)
    A = S1 @ q
    Bm = (S1 @ jnp.transpose(S2, (0, 2, 1))) @ c             # original assoc.
    out = jnp.concatenate([c, A, c * A, c * Bm], axis=2)
    return jnp.transpose(out, (0, 2, 1))


def _xavier_uniform(key, shape, fan_in, fan_out):
    bound = math.sqrt(6.0 / (fan_in + fan_out))
    return jax.random.uniform(key, shape, jnp.float32, -bound, bound)


if __name__ == "__main__":
    B, D, Lc, Lq = 2, 32, 16, 8

    key = jax.random.PRNGKey(0)
    kc, kq, k1, k2, k3 = jax.random.split(key, 5)

    # inputs in PyTorch layout: (B, d_model, L)
    C = jax.random.normal(kc, (B, D, Lc), jnp.float32)
    Q = jax.random.normal(kq, (B, D, Lq), jnp.float32)
    # masks: 1 for valid positions, 0 for padding (last few positions padded)
    Cmask = (jnp.arange(Lc)[None, :] < jnp.array([[Lc], [Lc - 4]])).astype(jnp.float32)
    Qmask = (jnp.arange(Lq)[None, :] < jnp.array([[Lq], [Lq - 2]])).astype(jnp.float32)

    # deterministic parameter init (shapes from __init__; xavier_uniform-style)
    w4C = _xavier_uniform(k1, (D, 1), fan_in=1, fan_out=D)
    w4Q = _xavier_uniform(k2, (D, 1), fan_in=1, fan_out=D)
    w4mlu = _xavier_uniform(k3, (1, 1, D), fan_in=D, fan_out=D)
    bias = jnp.zeros((1,), jnp.float32)

    ref = cq_attention_ref(C, Q, Cmask, Qmask, w4C, w4Q, w4mlu, bias)

    # --- f32 path: f32 inputs keep f32 MXU operands; exact-divide softmax
    #     gives a tight match vs the reference (only dot reassociation noise).
    out = cq_attention(C, Q, Cmask, Qmask, w4C, w4Q, w4mlu, bias)
    jax.block_until_ready(out)
    assert out.shape == (B, 4 * D, Lc)
    assert out.dtype == jnp.float32
    assert jnp.allclose(out, ref, atol=1e-3, rtol=1e-3), "f32 mismatch vs reference"

    # --- bf16 path: native bf16 inputs drive bf16 MXU operands and a bf16
    #     output slab (the recommended HBM-bound configuration).  Tolerance
    #     reflects bf16 rounding of the matmul operands and the bf16 output.
    C16 = C.astype(jnp.bfloat16)
    Q16 = Q.astype(jnp.bfloat16)
    out16 = cq_attention(C16, Q16, Cmask, Qmask, w4C, w4Q, w4mlu, bias)
    jax.block_until_ready(out16)
    assert out16.dtype == jnp.bfloat16
    ref16 = cq_attention_ref(C16.astype(jnp.float32), Q16.astype(jnp.float32),
                             Cmask, Qmask, w4C, w4Q, w4mlu, bias)
    assert jnp.allclose(out16.astype(jnp.float32), ref16, atol=1e-1, rtol=1e-1), \
        "bf16 mismatch vs reference"

    print("KERNEL_OK")
</pallas_src>

<mosaic_0001>
module attributes {stable_mosaic.version = 11 : i64} {
  func.func @_cq_attention_kernel(%arg0: i32, %arg1: memref<1x32x128xf32, #tpu.memory_space<vmem>>, %arg2: memref<1x32x128xf32, #tpu.memory_space<vmem>>, %arg3: memref<32x3xf32, #tpu.memory_space<vmem>>, %arg4: memref<1x1x128xf32, #tpu.memory_space<vmem>>, %arg5: memref<1x128x1xf32, #tpu.memory_space<vmem>>, %arg6: memref<1xf32, #tpu.memory_space<smem>>, %arg7: memref<1x128x128xf32, #tpu.memory_space<vmem>>) attributes {dimension_semantics = [#tpu.dimension_semantics<parallel>], iteration_bounds = array<i64: 2>, scalar_prefetch = 0 : i64, scratch_operands = 0 : i64, tpu.core_type = #tpu.core_type<tc>, window_params = [{transform_indices = @transform_0, window_bounds = array<i64: 1, 32, 128>}, {transform_indices = @transform_1, window_bounds = array<i64: 1, 32, 128>}, {pipeline_mode = #tpu.pipeline_mode<synchronous>, transform_indices = @transform_2, window_bounds = array<i64: 32, 3>}, {transform_indices = @transform_3, window_bounds = array<i64: 1, 1, 128>}, {transform_indices = @transform_4, window_bounds = array<i64: 1, 128, 1>}, {transform_indices = @transform_5, window_bounds = array<i64: 1>}, {transform_indices = @transform_6, window_bounds = array<i64: 1, 128, 128>}]} {
    %c0 = arith.constant 0 : index
    %c0_0 = arith.constant 0 : index
    %c0_1 = arith.constant 0 : index
    %0 = vector.load %arg1[%c0, %c0_0, %c0_1] : memref<1x32x128xf32, #tpu.memory_space<vmem>>, vector<1x32x128xf32>
    %1 = vector.shape_cast %0 : vector<1x32x128xf32> to vector<32x128xf32>
    %c0_2 = arith.constant 0 : index
    %c0_3 = arith.constant 0 : index
    %c0_4 = arith.constant 0 : index
    %2 = vector.load %arg2[%c0_2, %c0_3, %c0_4] : memref<1x32x128xf32, #tpu.memory_space<vmem>>, vector<1x32x128xf32>
    %3 = vector.shape_cast %2 : vector<1x32x128xf32> to vector<32x128xf32>
    %c0_5 = arith.constant 0 : index
    %c0_6 = arith.constant 0 : index
    %4 = vector.load %arg3[%c0_5, %c0_6] : memref<32x3xf32, #tpu.memory_space<vmem>>, vector<32x3xf32>
    %5 = vector.extract_strided_slice %4 {offsets = [0, 0], sizes = [32, 1], strides = [1, 1]} : vector<32x3xf32> to vector<32x1xf32>
    %6 = vector.extract_strided_slice %4 {offsets = [0, 1], sizes = [32, 1], strides = [1, 1]} : vector<32x3xf32> to vector<32x1xf32>
    %7 = vector.extract_strided_slice %4 {offsets = [0, 2], sizes = [32, 1], strides = [1, 1]} : vector<32x3xf32> to vector<32x1xf32>
    %c0_7 = arith.constant 0 : index
    %c0_8 = arith.constant 0 : index
    %c0_9 = arith.constant 0 : index
    %8 = vector.load %arg4[%c0_7, %c0_8, %c0_9] : memref<1x1x128xf32, #tpu.memory_space<vmem>>, vector<1x1x128xf32>
    %9 = vector.shape_cast %8 : vector<1x1x128xf32> to vector<1x128xf32>
    %c0_10 = arith.constant 0 : index
    %c0_11 = arith.constant 0 : index
    %c0_12 = arith.constant 0 : index
    %10 = vector.load %arg5[%c0_10, %c0_11, %c0_12] : memref<1x128x1xf32, #tpu.memory_space<vmem>>, vector<1x128x1xf32>
    %11 = vector.shape_cast %10 : vector<1x128x1xf32> to vector<128x1xf32>
    %c0_13 = arith.constant 0 : index
    %12 = memref.load %arg6[%c0_13] : memref<1xf32, #tpu.memory_space<smem>>
    %c0_14 = arith.constant 0 : index
    %c0_15 = arith.constant 0 : index
    %c0_16 = arith.constant 0 : index
    %13 = vector.load %arg7[%c0_14, %c0_15, %c0_16] : memref<1x128x128xf32, #tpu.memory_space<vmem>>, vector<1x32x128xf32>
    %14 = vector.shape_cast %13 : vector<1x32x128xf32> to vector<32x128xf32>
    %15 = vector.shape_cast %1 : vector<32x128xf32> to vector<1x32x128xf32>
    tpu.vector_store %arg7[%c0_14, %c0_15, %c0_16], %15 {strides = array<i32>} : memref<1x128x128xf32, #tpu.memory_space<vmem>>, vector<1x32x128xf32>,
    %16 = vector.broadcast %7 : vector<32x1xf32> to vector<32x128xf32>
    %17 = arith.mulf %16, %3 : vector<32x128xf32>
    %18 = vector.broadcast %5 : vector<32x1xf32> to vector<32x128xf32>
    %19 = arith.addf %17, %18 : vector<32x128xf32>
    %cst = arith.constant dense<0.000000e+00> : vector<128x128xf32>
    %20 = tpu.matmul %1, %19, %cst {dimension_numbers = #tpu.dot_dimension_numbers<[0], [0], [1], [1], [0, 1, 1, 1], [], []>} : vector<32x128xf32>, vector<32x128xf32>, vector<128x128xf32> -> vector<128x128xf32>
    %21 = vector.broadcast %6 : vector<32x1xf32> to vector<32x128xf32>
    %22 = arith.mulf %3, %21 : vector<32x128xf32>
    %cst_17 = arith.constant dense<0.000000e+00> : vector<128xf32>
    %23 = vector.multi_reduction <add>, %22, %cst_17 [0] : vector<32x128xf32> to vector<128xf32>
    %24 = vector.shape_cast %23 : vector<128xf32> to vector<1x128xf32>
    %25 = vector.broadcast %12 : f32 to vector<1x128xf32>
    %26 = arith.addf %24, %25 : vector<1x128xf32>
    %27 = vector.broadcast %26 : vector<1x128xf32> to vector<128x128xf32>
    %28 = arith.addf %20, %27 : vector<128x128xf32>
    %29 = vector.broadcast %9 : vector<1x128xf32> to vector<128x128xf32>
    %30 = arith.addf %28, %29 : vector<128x128xf32>
    %31 = vector.broadcast %11 : vector<128x1xf32> to vector<128x128xf32>
    %32 = arith.addf %28, %31 : vector<128x128xf32>
    %cst_18 = arith.constant dense<0xFF800000> : vector<128xf32>
    %33 = vector.multi_reduction <maximumf>, %30, %cst_18 [1] : vector<128x128xf32> to vector<128xf32>
    %34 = vector.shape_cast %33 : vector<128xf32> to vector<128x1xf32>
    %35 = vector.broadcast %34 : vector<128x1xf32> to vector<128x128xf32>
    %36 = arith.subf %30, %35 : vector<128x128xf32>
    %37 = math.exp %36 : vector<128x128xf32>
    %cst_19 = arith.constant dense<0.000000e+00> : vector<128xf32>
    %38 = vector.multi_reduction <add>, %37, %cst_19 [1] : vector<128x128xf32> to vector<128xf32>
    %39 = vector.shape_cast %38 : vector<128xf32> to vector<128x1xf32>
    %40 = vector.broadcast %39 : vector<128x1xf32> to vector<128x128xf32>
    %41 = arith.divf %37, %40 : vector<128x128xf32>
    %cst_20 = arith.constant dense<0xFF800000> : vector<128xf32>
    %42 = vector.multi_reduction <maximumf>, %32, %cst_20 [0] : vector<128x128xf32> to vector<128xf32>
    %43 = vector.shape_cast %42 : vector<128xf32> to vector<1x128xf32>
    %44 = vector.broadcast %43 : vector<1x128xf32> to vector<128x128xf32>
    %45 = arith.subf %32, %44 : vector<128x128xf32>
    %46 = math.exp %45 : vector<128x128xf32>
    %cst_21 = arith.constant dense<0.000000e+00> : vector<128xf32>
    %47 = vector.multi_reduction <add>, %46, %cst_21 [0] : vector<128x128xf32> to vector<128xf32>
    %48 = vector.shape_cast %47 : vector<128xf32> to vector<1x128xf32>
    %49 = vector.broadcast %48 : vector<1x128xf32> to vector<128x128xf32>
    %50 = arith.divf %46, %49 : vector<128x128xf32>
    %cst_22 = arith.constant dense<0.000000e+00> : vector<32x128xf32>
    %51 = tpu.matmul %1, %50, %cst_22 {dimension_numbers = #tpu.dot_dimension_numbers<[1], [0], [0], [1], [0, 0, 1, 1], [], []>} : vector<32x128xf32>, vector<128x128xf32>, vector<32x128xf32> -> vector<32x128xf32>
    %52 = tpu.concatenate %3, %51 in 0 : vector<32x128xf32>, vector<32x128xf32> -> vector<64x128xf32>
    %cst_23 = arith.constant dense<0.000000e+00> : vector<64x128xf32>
    %53 = tpu.matmul %52, %41, %cst_23 {dimension_numbers = #tpu.dot_dimension_numbers<[1], [1], [0], [0], [0, 0, 1, 0], [], []>} : vector<64x128xf32>, vector<128x128xf32>, vector<64x128xf32> -> vector<64x128xf32>
    %54 = vector.extract_strided_slice %53 {offsets = [0, 0], sizes = [32, 128], strides = [1, 1]} : vector<64x128xf32> to vector<32x128xf32>
    %55 = vector.extract_strided_slice %53 {offsets = [32, 0], sizes = [32, 128], strides = [1, 1]} : vector<64x128xf32> to vector<32x128xf32>
    %c0_24 = arith.constant 0 : index
    %c32 = arith.constant 32 : index
    %c0_25 = arith.constant 0 : index
    %56 = vector.load %arg7[%c0_24, %c32, %c0_25] : memref<1x128x128xf32, #tpu.memory_space<vmem>>, vector<1x32x128xf32>
    %57 = vector.shape_cast %56 : vector<1x32x128xf32> to vector<32x128xf32>
    %58 = vector.shape_cast %54 : vector<32x128xf32> to vector<1x32x128xf32>
    tpu.vector_store %arg7[%c0_24, %c32, %c0_25], %58 {strides = array<i32>} : memref<1x128x128xf32, #tpu.memory_space<vmem>>, vector<1x32x128xf32>,
    %59 = arith.mulf %1, %54 : vector<32x128xf32>
    %c0_26 = arith.constant 0 : index
    %c64 = arith.constant 64 : index
    %c0_27 = arith.constant 0 : index
    %60 = vector.load %arg7[%c0_26, %c64, %c0_27] : memref<1x128x128xf32, #tpu.memory_space<vmem>>, vector<1x32x128xf32>
    %61 = vector.shape_cast %60 : vector<1x32x128xf32> to vector<32x128xf32>
    %62 = vector.shape_cast %59 : vector<32x128xf32> to vector<1x32x128xf32>
    tpu.vector_store %arg7[%c0_26, %c64, %c0_27], %62 {strides = array<i32>} : memref<1x128x128xf32, #tpu.memory_space<vmem>>, vector<1x32x128xf32>,
    %63 = arith.mulf %1, %55 : vector<32x128xf32>
    %c0_28 = arith.constant 0 : index
    %c96 = arith.constant 96 : index
    %c0_29 = arith.constant 0 : index
    %64 = vector.load %arg7[%c0_28, %c96, %c0_29] : memref<1x128x128xf32, #tpu.memory_space<vmem>>, vector<1x32x128xf32>
    %65 = vector.shape_cast %64 : vector<1x32x128xf32> to vector<32x128xf32>
    %66 = vector.shape_cast %63 : vector<32x128xf32> to vector<1x32x128xf32>
    tpu.vector_store %arg7[%c0_28, %c96, %c0_29], %66 {strides = array<i32>} : memref<1x128x128xf32, #tpu.memory_space<vmem>>, vector<1x32x128xf32>,
    return
  }
  func.func @transform_0(%arg0: i32) -> (i32, i32, i32) {
    %c0_i32 = arith.constant 0 : i32
    %c0_i32_0 = arith.constant 0 : i32
    %c0_i32_1 = arith.constant 0 : i32
    return %arg0, %c0_i32, %c0_i32_0 : i32, i32, i32
  }
  func.func @transform_1(%arg0: i32) -> (i32, i32, i32) {
    %c0_i32 = arith.constant 0 : i32
    %c0_i32_0 = arith.constant 0 : i32
    %c0_i32_1 = arith.constant 0 : i32
    return %arg0, %c0_i32, %c0_i32_0 : i32, i32, i32
  }
  func.func @transform_2(%arg0: i32) -> (i32, i32) {
    %c0_i32 = arith.constant 0 : i32
    %c0_i32_0 = arith.constant 0 : i32
    %c0_i32_1 = arith.constant 0 : i32
    return %c0_i32, %c0_i32_0 : i32, i32
  }
  func.func @transform_3(%arg0: i32) -> (i32, i32, i32) {
    %c0_i32 = arith.constant 0 : i32
    %c0_i32_0 = arith.constant 0 : i32
    %c0_i32_1 = arith.constant 0 : i32
    return %arg0, %c0_i32, %c0_i32_0 : i32, i32, i32
  }
  func.func @transform_4(%arg0: i32) -> (i32, i32, i32) {
    %c0_i32 = arith.constant 0 : i32
    %c0_i32_0 = arith.constant 0 : i32
    %c0_i32_1 = arith.constant 0 : i32
    return %arg0, %c0_i32, %c0_i32_0 : i32, i32, i32
  }
  func.func @transform_5(%arg0: i32) -> i32 {
    %c0_i32 = arith.constant 0 : i32
    %c0_i32_0 = arith.constant 0 : i32
    return %c0_i32 : i32
  }
  func.func @transform_6(%arg0: i32) -> (i32, i32, i32) {
    %c0_i32 = arith.constant 0 : i32
    %c0_i32_0 = arith.constant 0 : i32
    %c0_i32_1 = arith.constant 0 : i32
    return %arg0, %c0_i32, %c0_i32_0 : i32, i32, i32
  }
}

</mosaic_0001>

<bundles_post_ra>
// kernel: tpu_custom_call.1
= control target key start
LH: loop header
LB: loop body
LE: loop exit
PB: predicated region body
PF: predicated region fallthrough
CT: control target
= control target key end

     0   :  { %s2387_s0 = inlined_call_operand.vmem [shape: f32[2,32,128], index: 0, kind: input, shape index: {}]   ;;  %s2388_s1 = inlined_call_operand.vmem [shape: f32[2,32,128], index: 1, kind: input, shape index: {}]   ;;  %s2389_s2 = inlined_call_operand.vmem [shape: f32[32,3], index: 2, kind: input, shape index: {}]   ;;  %s2390_s3 = inlined_call_operand.vmem [shape: f32[2,1,128], index: 3, kind: input, shape index: {}]   ;;  %s2391_s4 = inlined_call_operand.vmem [shape: f32[2,128,1], index: 4, kind: input, shape index: {}]   ;;  %s2392_s5 = inlined_call_operand.<no memory space> [shape: f32[1], index: 5, kind: input, shape index: {}]   ;;  %s2393_s6 = inlined_call_operand.hbm [shape: f32[2,128,128], index: 6, kind: output, shape index: {}]  }
   0x1   :  { %11 = sst [smem:[#allocation2]] %s2392_s5 }
   0x2   :  { %12 = vsyncpa [#allocation4], 0 }
   0x3   :  { %14 = vsyncpa [#allocation4 + $0x1], 0  ;;  %s1691_s23 = smov 0   ;;  %s1693_s24 = smov 0  }
   0x4   :  { %s1695_s25 = smov 0   ;;  %s1697_s26 = smov 0  }
   0x5 LB: > { %s1712_s5 = sadd.s32 4294967295, %s1646_s26   ;;  %s1348_s27 = sadd.s32 4294967294, %s1646_s26   ;;  %s1646_s26 = sphi %s1697_s26, %s2409_s26   ;;  %s1642_s25 = sphi %s1695_s25, %s2408_s25   ;;  %s1638_s24 = sphi %s1693_s24, %s2407_s24   ;;  %s1634_s23 = sphi %s1691_s23, %s2406_s23  }
   0x6   : > { %s1716_s28 = sadd.s32 1, %s1646_s26   ;;  %s173_s29 = sadd.s32 1, %s1642_s25 }
   0x7   : > { %s170_s30 = ssub.s32 %s1646_s26, %s1716_s28  ;;  %p183_p0 = scmp.ne.s32.totalorder %s1642_s25, %s1638_s24 }
   0x8   : > { %p171_p1 = scmp.eq.s32.totalorder %s170_s30, 0  ;;  %p184_p2 = scmp.eq.s32.totalorder %s1712_s5, 1 }
   0x9   : > { %p189_p3 = scmp.ne.s32.totalorder %s1638_s24, %s1634_s23  ;;  %p190_p4 = scmp.eq.s32.totalorder %s1348_s27, 1 }
   0xa   : > { %s1727_s7 = scalar_select %p171_p1, %s1642_s25, %s173_s29  }
   0xb   : > { %p1729_p5 = por %p184_p2, %p183_p0  ;;  %p1733_p6 = por %p190_p4, %p189_p3 }
   0xc   : > { %p1351_p7 = scmp.ge.s32.totalorder %s1646_s26, 1  ;;  %p244_p8 = scmp.lt.s32.totalorder %s1646_s26, 3 }
   0xe   : > { %p245_p9 = pnand %p1351_p7, %p244_p8 }
   0xf   : > { %p287_p10 = scmp.lt.s32.totalorder (!%p245_p9), %s1712_s5, 1  ;;  %s284_s14 = sand.u32 (!%p245_p9), 1, %s1638_s24  }
  0x10   : > { %248 = sbr.rel (%p245_p9) target bundleno = 968 (0x3c8), region = 44  ;;  %s1352_s16 = sshll.u32 (!%p245_p9), %s284_s14, 7 }
  0x11   : > { %s1766_s29 = scalar_lea.vmem (!%p245_p9), [#allocation3], %s1352_s16 }
  0x12   : > { %s1250_s13 = sshll.u32 (!%p245_p9), %s1766_s29, 4  ;;  %s1251_s13 = int_to_ptr.vmem [resolvable:$true] %s1250_s13 }
  0x15   : > { %v316_v0 = vld [vmem:[%s2389_s2 + $0x18] sm:$0xff]  ;;  %v315_v1 = vld [vmem:[%s2389_s2 + $0x10] sm:$0xff]  ;;  %v1648_v2 = vmov 0   ;;  %v1649_v3 = vmov 2   ;;  %s1750_s15 = scalar_select %p287_p10, %s1712_s5, 1  ;;  %v314_v5 = vld [vmem:[%s2389_s2 + $0x8] sm:$0xff] }
  0x16   : > { %1468 = vset.pattern.permute.xlu2 %v1648_v2  ;;  %1466 = vset.pattern.permute.xlu1 %v1648_v2  ;;  %v313_v6 = vld [vmem:[%s2389_s2] sm:$0xff]  ;;  %v1650_v10 = vmov 1   ;;  %vm446_vm0 = vcmask 261120  }
  0x17   : > { %1465 = vset.pattern.permute.xlu0 %v1649_v3  ;;  %376 = vperm.xlu1 %1466, %v316_v0   ;;  %s1380_s17 = sshll.u32 %s1750_s15, 5  ;;  %s299_s20 = scalar_lea.vmem %s2390_s3, %s1750_s15 }
  0x18   : > { %356 = vperm.xlu0 %1465, %v316_v0   ;;  %372 = vperm.xlu2 %1468, %v315_v1   ;;  %s291_s27 = scalar_lea.vmem %s2387_s0, %s1380_s17  ;;  %s1799_s18 = scalar_lea.vmem %s2388_s1, %s1380_s17 }
  0x19   : > { %v1764_v4 = vld [vmem:[%s291_s27] sm:$0xff]  ;;  %v1776_v7 = vld [vmem:[%s291_s27 + $0x8] sm:$0xff]  ;;  %v1782_v8 = vld [vmem:[%s291_s27 + $0x10] sm:$0xff]  ;;  %s1382_s17 = sshll.u32 %s1750_s15, 7  ;;  %s1383_s15 = sshll.u32 %s1712_s5, 7 }
  0x1a   : > { %335 = vst [vmem:[%s1766_s29] sm:$0xff] %v1764_v4  ;;  %v1786_v9 = vld [vmem:[%s291_s27 + $0x18] sm:$0xff]  ;;  %v1807_v17 = vld [vmem:[%s1799_s18 + $0x10] sm:$0xff]  ;;  %v1811_v21 = vld [vmem:[%s1799_s18 + $0x8] sm:$0xff]  ;;  %s1824_s22 = scalar_lea.vmem %s2391_s4, %s1382_s17  ;;  %s334_s27 = sld [smem:[#allocation2]] }
  0x1b   : > { %336 = vst [vmem:[%s1766_s29 + $0x8] sm:$0xff] %v1776_v7  ;;  %v1802_v11 = vld [vmem:[%s1799_s18 + $0x18] sm:$0xff]  ;;  %v1814_v24 = vld [vmem:[%s1799_s18] sm:$0xff]  ;;  %v319_v32 = vld [vmem:[%s1824_s22 + $0x8] sm:$0xff]  ;;  %s1249_s12 = scalar_lea.hbm %s2393_s6, %s1383_s15 }
  0x1c   : > { %337 = vst [vmem:[%s1766_s29 + $0x10] sm:$0xff] %v1782_v8  ;;  %v318_v31 = vld [vmem:[%s1824_s22] sm:$0xff]  ;;  %v320_v33 = vld [vmem:[%s1824_s22 + $0x10] sm:$0xff]  ;;  %v321_v35 = vld [vmem:[%s1824_s22 + $0x18] sm:$0xff]  ;;  %s1252_s16 = sshll.u32 %s1249_s12, 4  ;;  %s1253_s16 = int_to_ptr.hbm [resolvable:$true] %s1252_s16 }
  0x1d   : > { %338 = vst [vmem:[%s1766_s29 + $0x18] sm:$0xff] %v1786_v9  ;;  %v322_v37 = vld [vmem:[%s1824_s22 + $0x20] sm:$0xff]  ;;  %v323_v39 = vld [vmem:[%s1824_s22 + $0x28] sm:$0xff]  ;;  %v324_v41 = vld [vmem:[%s1824_s22 + $0x30] sm:$0xff]  ;;  %s1598_s17 = sshra.s32 %s1253_s16, 4  ;;  %s1599_s17 = int_to_ptr.hbm [resolvable:$true] %s1598_s17 }
  0x1e   : > { %v326_v44 = vld [vmem:[%s1824_s22 + $0x40] sm:$0xff]  ;;  %v327_v46 = vld [vmem:[%s1824_s22 + $0x48] sm:$0xff]  ;;  %v328_v48 = vld [vmem:[%s1824_s22 + $0x50] sm:$0xff]  ;;  %s1600_s5 = scalar_lea.hbm %s1599_s17, 128  ;;  %p1605_p0 = scmp.lt.s32.totalorder %s1599_s17, %s2393_s6 }
  0x1f   : > { %1467 = vset.pattern.permute.xlu1 %v1649_v3  ;;  %v329_v50 = vld [vmem:[%s1824_s22 + $0x58] sm:$0xff]  ;;  %v330_v53 = vld [vmem:[%s1824_s22 + $0x60] sm:$0xff]  ;;  %v331_v55 = vld [vmem:[%s1824_s22 + $0x68] sm:$0xff]  ;;  %p1601_p11 = scmp.ne.s32.totalorder %s1599_s17, %s1600_s5 }
  0x20   : > { %1469 = vset.pattern.permute.xlu2 %v1649_v3  ;;  %351 = vperm.xlu0 %1465, %v315_v1   ;;  %v325_v51 = vld [vmem:[%s1824_s22 + $0x38] sm:$0xff]  ;;  %v332_v57 = vld [vmem:[%s1824_s22 + $0x70] sm:$0xff] }
  0x21   : > { %346 = vperm.xlu1 %1467, %v314_v5   ;;  %341 = vperm.xlu2 %1469, %v313_v6   ;;  %v333_v59 = vld [vmem:[%s1824_s22 + $0x78] sm:$0xff]  ;;  %p1602_p12 = pnand %p1601_p11, %p1729_p5  ;;  %s1604_s22 = scalar_lea.hbm %s2393_s6, 256 }
  0x22   : > { %p1606_p1 = scmp.lt.s32.totalorder %s1604_s22, %s1600_s5 }
  0x23   : > { %p1603_p13 = pneg %p1602_p12 }
  0x24   : > { %p1607_p2 = por %p1606_p1, %p1605_p0 }
  0x26   : > { %p1608_p3 = pnand %p1607_p2, %p1603_p13 }
  0x28   : > { %1470 = vset.pattern.permute.xlu0 %v1648_v2 }
  0x29   : > { %368 = vperm.xlu0 %1470, %v314_v5   ;;  %1471 = vset.pattern.permute.xlu1 %v1648_v2 }
  0x2a   : > { %364 = vperm.xlu1 %1471, %v313_v6  }
  0x31   : > { %1473 = vset.pattern.permute.xlu0 %v1650_v10 }
  0x32   : > { %1472 = vset.pattern.permute.xlu1 %v1650_v10  ;;  %388 = vperm.xlu0 %1473, %v314_v5  }
  0x33   : > { %384 = vperm.xlu1 %1472, %v313_v6  }
  0x3a   : > { %1474 = vset.pattern.permute.xlu0 %v1648_v2 }
  0x3b   : > { %392 = vperm.xlu1 %1472, %v315_v1   ;;  %581 = vperm.xlu0 %1474, %v318_v31  }
  0x43   : > { %396 = vperm.xlu1 %1472, %v316_v0   ;;  %596 = vperm.xlu0 %1474, %v321_v35  }
  0x47   : > { %414 = vxpose.xlu2.b32.start [1/4] (short) %v1764_v4, 128 }
  0x4b   : > { %1475 = vset.pattern.permute.xlu1 %v1648_v2  ;;  %606 = vperm.xlu0 %1474, %v323_v39  }
  0x4c   : > { %586 = vperm.xlu1 %1475, %v319_v32  }
  0x4f   : > { %415 = vxpose.xlu2.b32.cont [2/4] (short) %v1776_v7, 128 }
  0x53   : > { %621 = vperm.xlu0 %1474, %v326_v44  }
  0x54   : > { %591 = vperm.xlu1 %1475, %v320_v33  }
  0x57   : > { %416 = vxpose.xlu2.b32.cont [3/4] (short) %v1782_v8, 128 }
  0x5b   : > { %631 = vperm.xlu0 %1474, %v328_v48  }
  0x5c   : > { %601 = vperm.xlu1 %1475, %v322_v37   ;;  %v412_v37 = vstv %s334_s27 }
  0x5f   : > { %417 = vxpose.xlu2.b32.end [4/4] (short) %v1786_v9, 128 }
  0x63   : > { %641 = vperm.xlu0 %1474, %v330_v53  }
  0x64   : > { %611 = vperm.xlu1 %1475, %v324_v41  }
  0x6b   : > { %651 = vperm.xlu0 %1474, %v332_v57  }
  0x6c   : > { %626 = vperm.xlu1 %1475, %v327_v46  }
  0x72   : > { %v373_v16 = vpop.permute.xlu2 %372 }
  0x74   : > { %636 = vperm.xlu1 %1475, %v329_v50  }
  0x7b   : > { %v342_v23 = vpop.permute.xlu2 %341 }
  0x7c   : > { %v359_v26 = vmul.f32 %v342_v23, %v1814_v24  ;;  %646 = vperm.xlu1 %1475, %v331_v55  }
  0x84   : > { %656 = vperm.xlu1 %1475, %v333_v59  }
  0x89   : > { %v377_v12 = vpop.permute.xlu1 %376 }
  0x8a   : > { %v357_v13 = vpop.permute.xlu0 %356 }
  0x8b   : > { %v362_v14 = vmul.f32 %v357_v13, %v1802_v11 }
  0x8d   : > { %v382_v15 = vadd.f32 %v377_v12, %v362_v14 }
  0x8f   : > { %507 = vmatpush.msra.mxu0 %v382_v15  ;;  %1384 = vmatpush.msra.mxu1 %v382_v15 }
  0x92   : > { %v352_v18 = vpop.permute.xlu0 %351 }
  0x93   : > { %v361_v19 = vmul.f32 %v352_v18, %v1807_v17  ;;  %v347_v20 = vpop.permute.xlu1 %346 }
  0x94   : > { %v360_v25 = vmul.f32 %v347_v20, %v1811_v21 }
  0x95   : > { %v381_v22 = vadd.f32 %v373_v16, %v361_v19 }
  0x97   : > { %508 = vmatpush.msra.mxu0 %v381_v22  ;;  %1385 = vmatpush.msra.mxu1 %v381_v22 }
  0x9b   : > { %v369_v27 = vpop.permute.xlu0 %368 }
  0x9c   : > { %v380_v28 = vadd.f32 %v369_v27, %v360_v25  ;;  %v365_v29 = vpop.permute.xlu1 %364 }
  0x9d   : > { %v379_v30 = vadd.f32 %v365_v29, %v359_v26 }
  0x9e   : > { %509 = vmatpush.msra.mxu0 %v380_v28  ;;  %1386 = vmatpush.msra.mxu1 %v380_v28 }
  0xa0   : > { %510 = vmatpush.msra.mxu0 %v379_v30  ;;  %1387 = vmatpush.msra.mxu1 %v379_v30 }
  0xa4   : > { %v389_v6 = vpop.permute.xlu0 %388 }
  0xa5   : > { %v385_v1 = vpop.permute.xlu1 %384  ;;  %v400_v13 = vmul.f32 %v389_v6, %v1811_v21 }
  0xa6   : > { %v399_v12 = vmul.f32 %v385_v1, %v1814_v24 }
  0xa8   : > { %v403_v15 = vadd.f32 %v400_v13, %v399_v12 }
  0xad   : > { %v393_v3 = vpop.permute.xlu1 %392  ;;  %v582_v23 = vpop.permute.xlu0 %581 }
  0xae   : > { %v401_v14 = vmul.f32 %v393_v3, %v1807_v17 }
  0xb0   : > { %v404_v20 = vadd.f32 %v403_v15, %v401_v14 }
  0xb5   : > { %v397_v10 = vpop.permute.xlu1 %396  ;;  %v597_v29 = vpop.permute.xlu0 %596 }
  0xb6   : > { %v402_v19 = vmul.f32 %v397_v10, %v1802_v11 }
  0xb8   : > { %v405_v22 = vadd.f32 %v404_v20, %v402_v19 }
  0xba   : > { %v406_v26 = vrot.slane %v405_v22, 4 }
  0xbc   : > { %v407_v28 = vadd.f32 %v406_v26, %v405_v22 }
  0xbd   : > { %v607_v17 = vpop.permute.xlu0 %606 }
  0xbe   : > { %v587_v18 = vpop.permute.xlu1 %586  ;;  %v408_v30 = vrot.slane %v407_v28, 2 }
  0xc0   : > { %v409_v32 = vadd.f32 %v408_v30, %v407_v28 }
  0xc1   : > { %1476 = vset.pattern.permute.xlu2 %v1648_v2 }
  0xc2   : > { %v410_v33 = vrot.slane %v409_v32, 1 }
  0xc6   : > { %v592_v27 = vpop.permute.xlu1 %591 }
  0xce   : > { %v602_v31 = vpop.permute.xlu1 %601 }
  0xe0   : > { %v430_v34 = vpop.trf.xlu2 }
  0xe1   : > { %1359 = vmatmul.msk.f32.vlgmr.msra.gmra.mxu0 %vm446_vm0, %v430_v34  ;;  %v612_v34 = vpop.permute.xlu1 %611 }
  0xe8   : > { %v431_v36 = vpop.trf.xlu2 }
  0xe9   : > { %1360 = vmatmul.msk.f32.gmra.mxu0 %vm446_vm0, %v431_v36  ;;  %v411_v36 = vadd.f32 %v410_v33, %v409_v32 }
  0xeb   : > { %v413_v39 = vadd.f32 %v412_v37, %v411_v36 }
  0xf0   : > { %v432_v38 = vpop.trf.xlu2 }
  0xf1   : > { %1361 = vmatmul.msk.f32.gmra.mxu0 %vm446_vm0, %v432_v38  ;;  %v622_v38 = vpop.permute.xlu0 %621 }
  0xf8   : > { %v433_v40 = vpop.trf.xlu2 }
  0xf9   : > { %1362 = vmatmul.msk.f32.gmra.mxu0 %vm446_vm0, %v433_v40  ;;  %v627_v40 = vpop.permute.xlu1 %626  ;;  %v632_v46 = vpop.permute.xlu0 %631 }
 0x100   : > { %v434_v42 = vpop.trf.xlu2 }
 0x101   : > { %1363 = vmatmul.msk.f32.gmra.mxu0 %vm446_vm0, %v434_v42  ;;  %v1867_v42 = vld [vmem:[%s299_s20] ss:$0 sm:$0xff] }
 0x108   : > { %v435_v43 = vpop.trf.xlu2 }
 0x109   : > { %1364 = vmatmul.msk.f32.gmra.mxu0 %vm446_vm0, %v435_v43 }
 0x110   : > { %v436_v45 = vpop.trf.xlu2 }
 0x111   : > { %1365 = vmatmul.msk.f32.gmra.mxu0 %vm446_vm0, %v436_v45 }
 0x118   : > { %v437_v47 = vpop.trf.xlu2 }
 0x119   : > { %1366 = vmatmul.msk.f32.gmra.mxu0 %vm446_vm0, %v437_v47  ;;  %v637_v47 = vpop.permute.xlu1 %636 }
 0x120   : > { %v438_v49 = vpop.trf.xlu2 }
 0x121   : > { %1367 = vmatmul.msk.f32.gmra.mxu0 %vm446_vm0, %v438_v49  ;;  %v647_v57 = vpop.permute.xlu1 %646 }
 0x128   : > { %v439_v52 = vpop.trf.xlu2  ;;  %616 = vperm.xlu2 %1476, %v325_v51  }
 0x129   : > { %1368 = vmatmul.msk.f32.gmra.mxu0 %vm446_vm0, %v439_v52  ;;  %v642_v52 = vpop.permute.xlu0 %641  ;;  %v657_v32 = vpop.permute.xlu1 %656 }
 0x130   : > { %v440_v54 = vpop.trf.xlu2 }
 0x131   : > { %1369 = vmatmul.msk.f32.vlgmr.msra.gmra.mxu1 %vm446_vm0, %v440_v54  ;;  %v652_v28 = vpop.permute.xlu0 %651 }
 0x138   : > { %v441_v56 = vpop.trf.xlu2 }
 0x139   : > { %1370 = vmatmul.msk.f32.gmra.mxu1 %vm446_vm0, %v441_v56 }
 0x140   : > { %v442_v58 = vpop.trf.xlu2 }
 0x141   : > { %1371 = vmatmul.msk.f32.gmra.mxu1 %vm446_vm0, %v442_v58 }
 0x148   : > { %v443_v60 = vpop.trf.xlu2 }
 0x149   : > { %1372 = vmatmul.msk.f32.gmra.mxu1 %vm446_vm0, %v443_v60 }
 0x150   : > { %v444_v61 = vpop.trf.xlu2 }
 0x151   : > { %1373 = vmatmul.msk.f32.gmra.mxu1 %vm446_vm0, %v444_v61 }
 0x158   : > { %v445_v62 = vpop.trf.xlu2 }
 0x159   : > { %1374 = vmatmul.msk.f32.gmra.mxu1 %vm446_vm0, %v445_v62 }
 0x15e   : > { %v512_v63 = vpop.f32.mrf.mxu0 }
 0x15f   : > { %v1885_v59 = vadd.f32 %v512_v63, %v413_v39 }
 0x166   : > { %v515_v0 = vpop.f32.mrf.mxu0 }
 0x167   : > { %v1887_v60 = vadd.f32 %v515_v0, %v413_v39 }
 0x16e   : > { %v518_v2 = vpop.f32.mrf.mxu0 }
 0x16f   : > { %v1891_v3 = vadd.f32 %v518_v2, %v413_v39 }
 0x171   : > { %v661_v20 = vadd.f32 %v592_v27, %v1891_v3 }
 0x176   : > { %v521_v5 = vpop.f32.mrf.mxu0 }
 0x177   : > { %v1893_v6 = vadd.f32 %v521_v5, %v413_v39  ;;  %v659_v5 = vadd.f32 %v582_v23, %v1885_v59 }
 0x179   : > { %v662_v22 = vadd.f32 %v597_v29, %v1893_v6 }
 0x17e   : > { %v524_v16 = vpop.f32.mrf.mxu0 }
 0x17f   : > { %v1879_v54 = vadd.f32 %v524_v16, %v413_v39  ;;  %v660_v16 = vadd.f32 %v587_v18, %v1887_v60 }
 0x181   : > { %v1902_v63 = vadd.f32 %v602_v31, %v1879_v54 }
 0x182   : > { %v617_v61 = vpop.permute.xlu2 %616 }
 0x183   : > { %v1027_v18 = vmax.f32 %v659_v5, %v1902_v63 }
 0x186   : > { %v527_v25 = vpop.f32.mrf.mxu0 }
 0x187   : > { %v1877_v53 = vadd.f32 %v527_v25, %v413_v39 }
 0x189   : > { %v1896_v13 = vadd.f32 %v607_v17, %v1877_v53 }
 0x18b   : > { %v1028_v30 = vmax.f32 %v660_v16, %v1896_v13 }
 0x18e   : > { %v530_v24 = vpop.f32.mrf.mxu0 }
 0x18f   : > { %v1881_v55 = vadd.f32 %v530_v24, %v413_v39 }
 0x191   : > { %v1905_v0 = vadd.f32 %v612_v34, %v1881_v55 }
 0x193   : > { %v1029_v24 = vmax.f32 %v661_v20, %v1905_v0 }
 0x196   : > { %v533_v11 = vpop.f32.mrf.mxu0 }
 0x197   : > { %v1883_v56 = vadd.f32 %v533_v11, %v413_v39 }
 0x199   : > { %v1908_v2 = vadd.f32 %v617_v61, %v1883_v56 }
 0x19e   : > { %v536_v45 = vpop.f32.mrf.mxu0 }
 0x19f   : > { %v537_v10 = vadd.f32 %v536_v45, %v413_v39 }
 0x1a1   : > { %v1918_v25 = vadd.f32 %v622_v38, %v537_v10 }
 0x1a6   : > { %v539_v51 = vpop.f32.mrf.mxu0 }
 0x1a7   : > { %v1889_v62 = vadd.f32 %v539_v51, %v413_v39  ;;  %v1953_v51 = vadd.f32 %v1867_v42, %v537_v10 }
 0x1a9   : > { %v1913_v19 = vadd.f32 %v627_v40, %v1889_v62 }
 0x1ab   : > { %v1032_v29 = vmax.f32 %v1028_v30, %v1913_v19 }
 0x1ae   : > { %v542_v21 = vpop.f32.mrf.mxu1 }
 0x1af   : > { %v543_v12 = vadd.f32 %v542_v21, %v413_v39  ;;  %v1030_v21 = vmax.f32 %v662_v22, %v1908_v2 }
 0x1b1   : > { %v1920_v26 = vadd.f32 %v632_v46, %v543_v12  ;;  %v1938_v36 = vadd.f32 %v1867_v42, %v543_v12  ;;  %v1962_v12 = vadd.f32 %v1867_v42, %v1881_v55 }
 0x1b3   : > { %v1033_v11 = vmax.f32 %v1029_v24, %v1920_v26 }
 0x1b6   : > { %v545_v35 = vpop.f32.mrf.mxu1 }
 0x1b7   : > { %v546_v14 = vadd.f32 %v545_v35, %v413_v39  ;;  %v1031_v35 = vmax.f32 %v1027_v18, %v1918_v25 }
 0x1b9   : > { %v1923_v31 = vadd.f32 %v637_v47, %v546_v14 }
 0x1bb   : > { %v1034_v37 = vmax.f32 %v1030_v21, %v1923_v31 }
 0x1be   : > { %v548_v41 = vpop.f32.mrf.mxu1 }
 0x1bf   : > { %v549_v43 = vadd.f32 %v548_v41, %v413_v39 }
 0x1c1   : > { %v1870_v44 = vadd.f32 %v1867_v42, %v549_v43  ;;  %v1931_v17 = vadd.f32 %v642_v52, %v549_v43  ;;  %v1956_v52 = vadd.f32 %v1867_v42, %v546_v14 }
 0x1c3   : > { %699 = vmax.xlane.f32.xlu1 %v1870_v44  ;;  %v1035_v43 = vmax.f32 %v1031_v35, %v1931_v17 }
 0x1c6   : > { %v551_v48 = vpop.f32.mrf.mxu1 }
 0x1c7   : > { %v552_v49 = vadd.f32 %v551_v48, %v413_v39 }
 0x1c9   : > { %v1874_v50 = vadd.f32 %v1867_v42, %v552_v49  ;;  %v1925_v23 = vadd.f32 %v647_v57, %v552_v49 }
 0x1cb   : > { %701 = vmax.xlane.f32.xlu0 %v1874_v50  ;;  %v1036_v38 = vmax.f32 %v1032_v29, %v1925_v23 }
 0x1cd   : > { %v1039_v46 = vmax.f32 %v1035_v43, %v1036_v38 }
 0x1ce   : > { %v554_v58 = vpop.f32.mrf.mxu1 }
 0x1cf   : > { %v555_v1 = vadd.f32 %v554_v58, %v413_v39 }
 0x1d1   : > { %v1899_v15 = vadd.f32 %v1867_v42, %v555_v1  ;;  %v1933_v33 = vadd.f32 %v652_v28, %v555_v1  ;;  %v1966_v28 = vadd.f32 %v1867_v42, %v1883_v56  ;;  %v1978_v56 = vadd.f32 %v1867_v42, %v1879_v54 }
 0x1d3   : > { %703 = vmax.xlane.f32.xlu1 %v1899_v15 }
 0x1d6   : > { %v557_v27 = vpop.f32.mrf.mxu1 }
 0x1d7   : > { %v558_v34 = vadd.f32 %v557_v27, %v413_v39  ;;  %v1037_v39 = vmax.f32 %v1033_v11, %v1933_v33  ;;  %v1982_v27 = vadd.f32 %v1867_v42, %v1889_v62 }
 0x1d9   : > { %v1942_v40 = vadd.f32 %v657_v32, %v558_v34  ;;  %v1945_v41 = vadd.f32 %v1867_v42, %v558_v34  ;;  %v1998_v34 = vadd.f32 %v1867_v42, %v1877_v53 }
 0x1db   : > { %v1038_v45 = vmax.f32 %v1034_v37, %v1942_v40  ;;  %695 = vmax.xlane.f32.xlu1 %v1938_v36  ;;  %705 = vmax.xlane.f32.xlu0 %v1945_v41 }
 0x1dd   : > { %v1040_v47 = vmax.f32 %v1037_v39, %v1038_v45 }
 0x1df   : > { %v1041_v48 = vmax.f32 %v1039_v46, %v1040_v47 }
 0x1e1   : > { %v1042_v49 = vrot.slane %v1041_v48, 4 }
 0x1e3   : > { %v1043_v57 = vmax.f32 %v1041_v48, %v1042_v49  ;;  %691 = vmax.xlane.f32.xlu1 %v1953_v51  ;;  %697 = vmax.xlane.f32.xlu0 %v1956_v52  ;;  %v2024_v49 = vadd.f32 %v1867_v42, %v1893_v6 }
 0x1e5   : > { %v1044_v58 = vrot.slane %v1043_v57, 2 }
 0x1e7   : > { %v1045_v61 = vmax.f32 %v1043_v57, %v1044_v58 }
 0x1e9   : > { %v1046_v1 = vrot.slane %v1045_v61, 1 }
 0x1eb   : > { %v1968_v10 = vmax.f32 %v1045_v61, %v1046_v1  ;;  %687 = vmax.xlane.f32.xlu1 %v1962_v12  ;;  %689 = vmax.xlane.f32.xlu0 %v1966_v28 }
 0x1ed   : > { %v1048_v14 = vsub.f32 %v659_v5, %v1968_v10  ;;  %v1049_v30 = vsub.f32 %v660_v16, %v1968_v10  ;;  %v1050_v18 = vsub.f32 %v661_v20, %v1968_v10  ;;  %v1051_v24 = vsub.f32 %v662_v22, %v1968_v10 }
 0x1ee   : > { %v1052_v32 = vsub.f32 %v1902_v63, %v1968_v10  ;;  %v1053_v16 = vsub.f32 %v1896_v13, %v1968_v10  ;;  %v1054_v54 = vsub.f32 %v1905_v0, %v1968_v10  ;;  %v1055_v22 = vsub.f32 %v1908_v2, %v1968_v10 }
 0x1ef   : > { %v1064_v55 = vmul.f32 1.442695, %v1048_v14  ;;  %v1066_v21 = vmul.f32 1.442695, %v1049_v30  ;;  %v1068_v5 = vmul.f32 1.442695, %v1050_v18  ;;  %v1056_v13 = vsub.f32 %v1918_v25, %v1968_v10 }
 0x1f0   : > { %v1070_v20 = vmul.f32 1.442695, %v1051_v24  ;;  %v1072_v62 = vmul.f32 1.442695, %v1052_v32  ;;  %v1074_v63 = vmul.f32 1.442695, %v1053_v16  ;;  %v1057_v37 = vsub.f32 %v1913_v19, %v1968_v10 }
 0x1f1   : > { %1478 = vpow2.f32 %v1064_v55  ;;  %v1076_v0 = vmul.f32 1.442695, %v1054_v54  ;;  %v1078_v53 = vmul.f32 1.442695, %v1055_v22  ;;  %v1058_v25 = vsub.f32 %v1920_v26, %v1968_v10 }
 0x1f2   : > { %1480 = vpow2.f32 %v1066_v21  ;;  %v1080_v39 = vmul.f32 1.442695, %v1056_v13  ;;  %v1059_v47 = vsub.f32 %v1923_v31, %v1968_v10  ;;  %v1082_v19 = vmul.f32 1.442695, %v1057_v37 }
 0x1f3   : > { %683 = vmax.xlane.f32.xlu1 %v1978_v56  ;;  %693 = vmax.xlane.f32.xlu0 %v1982_v27  ;;  %1482 = vpow2.f32 %v1068_v5  ;;  %v1060_v26 = vsub.f32 %v1931_v17, %v1968_v10  ;;  %v1084_v58 = vmul.f32 1.442695, %v1058_v25  ;;  %v1061_v1 = vsub.f32 %v1925_v23, %v1968_v10 }
 0x1f4   : > { %1484 = vpow2.f32 %v1070_v20  ;;  %v1086_v14 = vmul.f32 1.442695, %v1059_v47  ;;  %v1062_v18 = vsub.f32 %v1933_v33, %v1968_v10  ;;  %v1063_v21 = vsub.f32 %v1942_v40, %v1968_v10 }
 0x1f5   : > { %1486 = vpow2.f32 %v1072_v62  ;;  %v1088_v17 = vmul.f32 1.442695, %v1060_v26  ;;  %v1090_v32 = vmul.f32 1.442695, %v1061_v1  ;;  %v2043_v23 = vadd.f32 %v1867_v42, %v1891_v3 }
 0x1f6   : > { %1488 = vpow2.f32 %v1074_v63  ;;  %v1092_v20 = vmul.f32 1.442695, %v1062_v18  ;;  %v1094_v62 = vmul.f32 1.442695, %v1063_v21  ;;  %v2051_v3 = vadd.f32 %v1867_v42, %v1887_v60 }
 0x1f7   : > { %v1994_v29 = vpop.eup %1478  ;;  %1490 = vpow2.f32 %v1076_v0 }
 0x1f8   : > { %v2000_v35 = vpop.eup %1480  ;;  %1492 = vpow2.f32 %v1078_v53 }
 0x1f9   : > { %v1096_v11 = vadd.f32 %v2000_v35, %v1994_v29  ;;  %v2007_v2 = vpop.eup %1482  ;;  %1494 = vpow2.f32 %v1080_v39 }
 0x1fa   : > { %v2012_v43 = vpop.eup %1484  ;;  %1496 = vpow2.f32 %v1082_v19 }
 0x1fb   : > { %685 = vmax.xlane.f32.xlu0 %v1998_v34  ;;  %v1097_v38 = vadd.f32 %v2007_v2, %v1096_v11  ;;  %v2017_v46 = vpop.eup %1486  ;;  %1498 = vpow2.f32 %v1084_v58 }
 0x1fc   : > { %v2026_v57 = vpop.eup %1488  ;;  %1500 = vpow2.f32 %v1086_v14 }
 0x1fd   : > { %v1098_v45 = vadd.f32 %v2012_v43, %v1097_v38  ;;  %v2032_v31 = vpop.eup %1490  ;;  %1502 = vpow2.f32 %v1088_v17 }
 0x1fe   : > { %v1493_v30 = vpop.eup %1492  ;;  %1504 = vpow2.f32 %v1090_v32 }
 0x1ff   : > { %v1099_v48 = vadd.f32 %v2017_v46, %v1098_v45  ;;  %v1495_v55 = vpop.eup %1494  ;;  %1506 = vpow2.f32 %v1092_v20  ;;  %v2056_v45 = vadd.f32 %v1867_v42, %v1885_v59 }
 0x200   : > { %v2045_v16 = vpop.eup %1496  ;;  %1508 = vpow2.f32 %v1094_v62 }
 0x201   : > { %v1100_v61 = vadd.f32 %v2026_v57, %v1099_v48  ;;  %v1499_v54 = vpop.eup %1498 }
 0x202   : > { %v1501_v40 = vpop.eup %1500 }
 0x203   : > { %681 = vmax.xlane.f32.xlu0 %v2024_v49  ;;  %v1101_v6 = vadd.f32 %v2032_v31, %v1100_v61  ;;  %v1503_v63 = vpop.eup %1502 }
 0x204   : > { %v1505_v0 = vpop.eup %1504 }
 0x205   : > { %v1102_v24 = vadd.f32 %v1493_v30, %v1101_v6  ;;  %v1507_v37 = vpop.eup %1506 }
 0x206   : > { %v1509_v38 = vpop.eup %1508 }
 0x207   : > { %v1103_v5 = vadd.f32 %v1495_v55, %v1102_v24 }
 0x209   : > { %v1104_v33 = vadd.f32 %v2045_v16, %v1103_v5 }
 0x20b   : > { %679 = vmax.xlane.f32.xlu0 %v2043_v23  ;;  %v1105_v22 = vadd.f32 %v1499_v54, %v1104_v33 }
 0x20d   : > { %v1106_v10 = vadd.f32 %v1501_v40, %v1105_v22 }
 0x20f   : > { %v1107_v13 = vadd.f32 %v1503_v63, %v1106_v10 }
 0x211   : > { %v1108_v11 = vadd.f32 %v1505_v0, %v1107_v13 }
 0x213   : > { %677 = vmax.xlane.f32.xlu0 %v2051_v3  ;;  %v1109_v53 = vadd.f32 %v1507_v37, %v1108_v11 }
 0x215   : > { %v1110_v25 = vadd.f32 %v1509_v38, %v1109_v53 }
 0x217   : > { %v1111_v39 = vrot.slane %v1110_v25, 4 }
 0x219   : > { %v1112_v47 = vadd.f32 %v1111_v39, %v1110_v25 }
 0x21b   : > { %675 = vmax.xlane.f32.xlu0 %v2056_v45  ;;  %v1113_v19 = vrot.slane %v1112_v47, 2 }
 0x21d   : > { %v1114_v48 = vadd.f32 %v1113_v19, %v1112_v47 }
 0x21f   : > { %v1115_v60 = vrot.slane %v1114_v48, 1 }
 0x221   : > { %v1116_v26 = vadd.f32 %v1115_v60, %v1114_v48 }
 0x223   : > { %1510 = vrcp.f32 %v1116_v26  ;;  %v1128_v14 = vand.u32 2147483648, %v1116_v26  ;;  %v1126_v18 = vand.u32 2147483647, %v1116_v26  ;;  %vm1122_vm2 = vweird.f32 %v1116_v26 }
 0x225   : > { %v1129_v42 = vor.u32 1.1754944e-38, %v1128_v14  ;;  %vm1127_vm4 = vcmp.eq.f32.partialorder %v1126_v18, 8.507059e+37 }
 0x229   : > { %v1511_v58 = vpop.eup %1510 }
 0x22a   : > { %v1118_v61 = vmul.f32 %v1511_v58, %v1116_v26  ;;  %vm1123_vm1 = vweird.f32 %v1511_v58 }
 0x22b   : > { %vm1124_vm3 = vmor %vm1122_vm2, %vm1123_vm1 }
 0x22c   : > { %v1119_v1 = vsub.f32 1.0, %v1118_v61 }
 0x22e   : > { %v1120_v6 = vmul.f32 %v1511_v58, %v1119_v1 }
 0x230   : > { %v1121_v17 = vadd.f32 %v1511_v58, %v1120_v6 }
 0x232   : > { %v1125_v59 = vsel %vm1124_vm3, %v1511_v58, %v1121_v17 }
 0x233   : > { %v1130_v24 = vsel %vm1127_vm4, %v1129_v42, %v1125_v59 }
 0x234   : > { %v1146_v21 = vmul.f32 %v1509_v38, %v1130_v24  ;;  %v1145_v32 = vmul.f32 %v1507_v37, %v1130_v24  ;;  %v1139_v5 = vmul.f32 %v1495_v55, %v1130_v24  ;;  %v1138_v20 = vmul.f32 %v1493_v30, %v1130_v24 }
 0x235   : > { %v1137_v33 = vmul.f32 %v2032_v31, %v1130_v24  ;;  %v1136_v62 = vmul.f32 %v2026_v57, %v1130_v24  ;;  %v1135_v22 = vmul.f32 %v2017_v46, %v1130_v24  ;;  %v1134_v10 = vmul.f32 %v2012_v43, %v1130_v24 }
 0x236   : > { %1147 = vmatpush.msrb.mxu1 %v1146_v21  ;;  %v1133_v13 = vmul.f32 %v2007_v2, %v1130_v24  ;;  %v1144_v11 = vmul.f32 %v1505_v0, %v1130_v24  ;;  %v1132_v53 = vmul.f32 %v2000_v35, %v1130_v24  ;;  %v1131_v38 = vmul.f32 %v1994_v29, %v1130_v24  ;;  %v700_v55 = vpop.xlane.xlu1 %699 }
 0x237   : > { %v1143_v37 = vmul.f32 %v1503_v63, %v1130_v24  ;;  %v1142_v30 = vmul.f32 %v1501_v40, %v1130_v24  ;;  %v1141_v31 = vmul.f32 %v1499_v54, %v1130_v24  ;;  %v1140_v46 = vmul.f32 %v2045_v16, %v1130_v24 }
 0x238   : > { %1148 = vmatpush.msrb.mxu1 %v1145_v32  ;;  %v719_v19 = vsub.f32 %v1870_v44, %v700_v55 }
 0x23a   : > { %1149 = vmatpush.msrb.mxu1 %v1144_v11  ;;  %v747_v48 = vmul.f32 1.442695, %v719_v19 }
 0x23c   : > { %1150 = vmatpush.msrb.mxu1 %v1143_v37 }
 0x23e   : > { %1151 = vmatpush.msrb.mxu1 %v1142_v30  ;;  %v702_v43 = vpop.xlane.xlu0 %701 }
 0x23f   : > { %v720_v16 = vsub.f32 %v1874_v50, %v702_v43 }
 0x240   : > { %1152 = vmatpush.msrb.mxu1 %v1141_v31 }
 0x241   : > { %v749_v0 = vmul.f32 1.442695, %v720_v16 }
 0x242   : > { %1153 = vmatpush.msrb.mxu1 %v1140_v46 }
 0x244   : > { %1154 = vmatpush.msrb.mxu1 %v1139_v5 }
 0x246   : > { %v704_v2 = vpop.xlane.xlu1 %703  ;;  %1155 = vmatpush.msrb.mxu1 %v1138_v20 }
 0x247   : > { %v721_v57 = vsub.f32 %v1899_v15, %v704_v2 }
 0x248   : > { %1156 = vmatpush.msrb.mxu1 %v1137_v33 }
 0x249   : > { %v751_v35 = vmul.f32 1.442695, %v721_v57 }
 0x24a   : > { %1157 = vmatpush.msrb.mxu1 %v1136_v62 }
 0x24b   : > { %1512 = vpow2.f32 %v751_v35 }
 0x24c   : > { %1158 = vmatpush.msrb.mxu1 %v1135_v22 }
 0x24e   : > { %v706_v29 = vpop.xlane.xlu0 %705  ;;  %1159 = vmatpush.msrb.mxu1 %v1134_v10  ;;  %v696_v47 = vpop.xlane.xlu1 %695 }
 0x24f   : > { %v722_v40 = vsub.f32 %v1945_v41, %v706_v29 }
 0x250   : > { %1160 = vmatpush.msrb.mxu1 %v1133_v13 }
 0x251   : > { %v2069_v54 = vpop.eup %1512  ;;  %v753_v63 = vmul.f32 1.442695, %v722_v40 }
 0x252   : > { %783 = vadd.xlane.f32.xlu1 %v2069_v54  ;;  %1161 = vmatpush.msrb.mxu1 %v1132_v53 }
 0x253   : > { %1514 = vpow2.f32 %v753_v63 }
 0x254   : > { %1162 = vmatpush.msrb.mxu1 %v1131_v38  ;;  %1516 = vpow2.f32 %v749_v0 }
 0x255   : > { %1163 = vmatmul.f32.vlgmr.msrb.gmra.mxu1 %v1764_v4  ;;  %v717_v4 = vsub.f32 %v1938_v36, %v696_v47 }
 0x256   : > { %v698_v15 = vpop.xlane.xlu0 %697 }
 0x257   : > { %v718_v25 = vsub.f32 %v1956_v52, %v698_v15  ;;  %v692_v52 = vpop.xlane.xlu1 %691  ;;  %v743_v61 = vmul.f32 1.442695, %v717_v4 }
 0x258   : > { %v715_v14 = vsub.f32 %v1953_v51, %v692_v52 }
 0x259   : > { %v745_v39 = vmul.f32 1.442695, %v718_v25  ;;  %v2075_v41 = vpop.eup %1514 }
 0x25a   : > { %785 = vadd.xlane.f32.xlu1 %v2075_v41  ;;  %v2080_v60 = vpop.eup %1516  ;;  %v739_v17 = vmul.f32 1.442695, %v715_v14 }
 0x25b   : > { %1518 = vpow2.f32 %v745_v39 }
 0x25c   : > { %1520 = vpow2.f32 %v747_v48 }
 0x25d   : > { %1166 = vmatmul.f32.gmra.mxu1 %v1776_v7  ;;  %1522 = vpow2.f32 %v743_v61 }
 0x25e   : > { %v690_v50 = vpop.xlane.xlu0 %689 }
 0x25f   : > { %v714_v36 = vsub.f32 %v1966_v28, %v690_v50  ;;  %v688_v6 = vpop.xlane.xlu1 %687 }
 0x260   : > { %v713_v59 = vsub.f32 %v1962_v12, %v688_v6 }
 0x261   : > { %v2082_v26 = vpop.eup %1518  ;;  %v737_v42 = vmul.f32 1.442695, %v714_v36 }
 0x262   : > { %781 = vadd.xlane.f32.xlu1 %v2080_v60  ;;  %777 = vadd.xlane.f32.xlu0 %v2082_v26  ;;  %v2089_v1 = vpop.eup %1520  ;;  %v735_v24 = vmul.f32 1.442695, %v713_v59 }
 0x265   : > { %1169 = vmatmul.f32.gmra.mxu1 %v1782_v8 }
 0x266   : > { %v694_v58 = vpop.xlane.xlu0 %693 }
 0x267   : > { %v716_v44 = vsub.f32 %v1982_v27, %v694_v58  ;;  %v2095_v27 = vpop.eup %1522  ;;  %v684_v21 = vpop.xlane.xlu1 %683 }
 0x268   : > { %v711_v20 = vsub.f32 %v1978_v56, %v684_v21 }
 0x269   : > { %v741_v7 = vmul.f32 1.442695, %v716_v44 }
 0x26a   : > { %779 = vadd.xlane.f32.xlu1 %v2089_v1 }
 0x26b   : > { %1524 = vpow2.f32 %v741_v7 }
 0x26c   : > { %1526 = vpow2.f32 %v739_v17 }
 0x26d   : > { %1172 = vmatmul.f32.gmra.mxu1 %v1786_v9  ;;  %1528 = vpow2.f32 %v737_v42 }
 0x26e   : > { %v686_v18 = vpop.xlane.xlu0 %685  ;;  %1530 = vpow2.f32 %v735_v24 }
 0x26f   : > { %v712_v51 = vsub.f32 %v1998_v34, %v686_v18  ;;  %v731_v34 = vmul.f32 1.442695, %v711_v20 }
 0x271   : > { %v2097_v8 = vpop.eup %1524  ;;  %v733_v32 = vmul.f32 1.442695, %v712_v51 }
 0x272   : > { %775 = vadd.xlane.f32.xlu1 %v2095_v27  ;;  %773 = vadd.xlane.f32.xlu0 %v2097_v8  ;;  %v2103_v9 = vpop.eup %1526 }
 0x273   : > { %v2105_v5 = vpop.eup %1528  ;;  %1532 = vpow2.f32 %v733_v32 }
 0x274   : > { %v2111_v22 = vpop.eup %1530  ;;  %1534 = vpow2.f32 %v731_v34 }
 0x276   : > { %v682_v28 = vpop.xlane.xlu0 %681 }
 0x277   : > { %v710_v12 = vsub.f32 %v2024_v49, %v682_v28 }
 0x279   : > { %v729_v62 = vmul.f32 1.442695, %v710_v12  ;;  %v2113_v10 = vpop.eup %1532 }
 0x27a   : > { %771 = vadd.xlane.f32.xlu1 %v2103_v9  ;;  %769 = vadd.xlane.f32.xlu0 %v2105_v5  ;;  %v2119_v49 = vpop.eup %1534 }
 0x27b   : > { %1536 = vpow2.f32 %v729_v62 }
 0x27e   : > { %v680_v33 = vpop.xlane.xlu0 %679 }
 0x27f   : > { %v709_v56 = vsub.f32 %v2043_v23, %v680_v33 }
 0x281   : > { %v727_v53 = vmul.f32 1.442695, %v709_v56  ;;  %v2121_v37 = vpop.eup %1536 }
 0x282   : > { %767 = vadd.xlane.f32.xlu1 %v2111_v22  ;;  %765 = vadd.xlane.f32.xlu0 %v2113_v10 }
 0x286   : > { %v678_v13 = vpop.xlane.xlu0 %677 }
 0x287   : > { %v708_v11 = vsub.f32 %v2051_v3, %v678_v13 }
 0x289   : > { %v725_v38 = vmul.f32 1.442695, %v708_v11 }
 0x28a   : > { %763 = vadd.xlane.f32.xlu1 %v2119_v49  ;;  %761 = vadd.xlane.f32.xlu0 %v2121_v37 }
 0x28b   : > { %1538 = vpow2.f32 %v725_v38 }
 0x28c   : > { %1540 = vpow2.f32 %v727_v53 }
 0x28e   : > { %v676_v55 = vpop.xlane.xlu0 %675 }
 0x28f   : > { %v707_v30 = vsub.f32 %v2056_v45, %v676_v55 }
 0x291   : > { %v2126_v31 = vpop.eup %1538  ;;  %v723_v23 = vmul.f32 1.442695, %v707_v30 }
 0x292   : > { %v2128_v46 = vpop.eup %1540  ;;  %757 = vadd.xlane.f32.xlu0 %v2126_v31 }
 0x293   : > { %1542 = vpow2.f32 %v723_v23  ;;  %759 = vadd.xlane.f32.xlu1 %v2128_v46 }
 0x299   : > { %v2132_v3 = vpop.eup %1542 }
 0x29b   : > { %755 = vadd.xlane.f32.xlu1 %v2132_v3 }
 0x2c5   : > { %v784_v43 = vpop.xlane.xlu1 %783 }
 0x2c6   : > { %1544 = vrcp.f32 %v784_v43  ;;  %v1008_v50 = vand.u32 2147483648, %v784_v43  ;;  %vm1002_vm8 = vweird.f32 %v784_v43  ;;  %v1006_v52 = vand.u32 2147483647, %v784_v43 }
 0x2c8   : > { %v1009_v6 = vor.u32 1.1754944e-38, %v1008_v50  ;;  %vm1007_vm12 = vcmp.eq.f32.partialorder %v1006_v52, 8.507059e+37 }
 0x2cc   : > { %v1545_v2 = vpop.eup %1544 }
 0x2cd   : > { %v786_v57 = vpop.xlane.xlu1 %785  ;;  %v998_v35 = vmul.f32 %v1545_v2, %v784_v43  ;;  %vm1003_vm6 = vweird.f32 %v1545_v2 }
 0x2ce   : > { %1546 = vrcp.f32 %v786_v57  ;;  %v1023_v39 = vand.u32 2147483648, %v786_v57  ;;  %v1021_v47 = vand.u32 2147483647, %v786_v57  ;;  %vm1017_vm7 = vweird.f32 %v786_v57  ;;  %vm1004_vm10 = vmor %vm1002_vm8, %vm1003_vm6 }
 0x2cf   : > { %v999_v45 = vsub.f32 1.0, %v998_v35 }
 0x2d0   : > { %v1024_v61 = vor.u32 1.1754944e-38, %v1023_v39  ;;  %vm1022_vm11 = vcmp.eq.f32.partialorder %v1021_v47, 8.507059e+37 }
 0x2d1   : > { %v1000_v15 = vmul.f32 %v1545_v2, %v999_v45 }
 0x2d3   : > { %v1001_v19 = vadd.f32 %v1545_v2, %v1000_v15 }
 0x2d4   : > { %v1547_v29 = vpop.eup %1546 }
 0x2d5   : > { %v1013_v40 = vmul.f32 %v1547_v29, %v786_v57  ;;  %v782_v63 = vpop.xlane.xlu1 %781  ;;  %v2135_v16 = vpop.xlane.xlu0 %777  ;;  %vm1018_vm5 = vweird.f32 %v1547_v29  ;;  %v1005_v36 = vsel %vm1004_vm10, %v1545_v2, %v1001_v19 }
 0x2d6   : > { %1548 = vrcp.f32 %v782_v63  ;;  %vm1019_vm9 = vmor %vm1017_vm7, %vm1018_vm5  ;;  %v993_v28 = vand.u32 2147483648, %v782_v63  ;;  %v1010_v24 = vsel %vm1007_vm12, %v1009_v6, %v1005_v36  ;;  %v991_v21 = vand.u32 2147483647, %v782_v63 }
 0x2d7   : > { %v1014_v0 = vsub.f32 1.0, %v1013_v40  ;;  %1550 = vrcp.f32 %v2135_v16  ;;  %vm987_vm14 = vweird.f32 %v782_v63  ;;  %v1011_v33 = vmul.f32 %v2069_v54, %v1010_v24 }
 0x2d8   : > { %v994_v34 = vor.u32 1.1754944e-38, %v993_v28  ;;  %vm992_vm0 = vcmp.eq.f32.partialorder %v991_v21, 8.507059e+37  ;;  %v963_v35 = vand.u32 2147483648, %v2135_v16  ;;  %vm957_vm5 = vweird.f32 %v2135_v16 }
 0x2d9   : > { %v1015_v25 = vmul.f32 %v1547_v29, %v1014_v0  ;;  %v961_v0 = vand.u32 2147483647, %v2135_v16 }
 0x2da   : > { %v964_v50 = vor.u32 1.1754944e-38, %v963_v35 }
 0x2db   : > { %v1016_v48 = vadd.f32 %v1547_v29, %v1015_v25  ;;  %vm962_vm8 = vcmp.eq.f32.partialorder %v961_v0, 8.507059e+37 }
 0x2dc   : > { %v1549_v4 = vpop.eup %1548 }
 0x2dd   : > { %v2138_v58 = vpop.eup %1550  ;;  %v983_v44 = vmul.f32 %v1549_v4, %v782_v63  ;;  %v2140_v7 = vpop.xlane.xlu1 %779  ;;  %v1020_v14 = vsel %vm1019_vm9, %v1547_v29, %v1016_v48  ;;  %vm988_vm13 = vweird.f32 %v1549_v4 }
 0x2de   : > { %1552 = vrcp.f32 %v2140_v7  ;;  %v953_v17 = vmul.f32 %v2138_v58, %v2135_v16  ;;  %v1025_v42 = vsel %vm1022_vm11, %v1024_v61, %v1020_v14  ;;  %vm989_vm15 = vmor %vm987_vm14, %vm988_vm13  ;;  %vm972_vm2 = vweird.f32 %v2140_v7 }
 0x2df   : > { %v984_v18 = vsub.f32 1.0, %v983_v44  ;;  %v1026_v59 = vmul.f32 %v2075_v41, %v1025_v42  ;;  %v978_v30 = vand.u32 2147483648, %v2140_v7  ;;  %v976_v43 = vand.u32 2147483647, %v2140_v7 }
 0x2e0   : > { %v954_v32 = vsub.f32 1.0, %v953_v17  ;;  %vm958_vm3 = vweird.f32 %v2138_v58 }
 0x2e1   : > { %v985_v51 = vmul.f32 %v1549_v4, %v984_v18  ;;  %1176 = vmatpush.xpose.msrb.mxu0 %v1026_v59  ;;  %1388 = vmatpush.xpose.msra.mxu2 %v1026_v59  ;;  %v979_v25 = vor.u32 1.1754944e-38, %v978_v30  ;;  %vm959_vm6 = vmor %vm957_vm5, %vm958_vm3  ;;  %vm977_vm7 = vcmp.eq.f32.partialorder %v976_v43, 8.507059e+37 }
 0x2e2   : > { %1389 = vmatpush.xpose.msra.mxu3 %v1026_v59  ;;  %v955_v11 = vmul.f32 %v2138_v58, %v954_v32 }
 0x2e3   : > { %v986_v20 = vadd.f32 %v1549_v4, %v985_v51 }
 0x2e4   : > { %v1553_v12 = vpop.eup %1552  ;;  %v956_v2 = vadd.f32 %v2138_v58, %v955_v11 }
 0x2e5   : > { %v968_v62 = vmul.f32 %v1553_v12, %v2140_v7  ;;  %v2148_v41 = vpop.xlane.xlu1 %775  ;;  %v2150_v56 = vpop.xlane.xlu0 %773  ;;  %v990_v13 = vsel %vm989_vm15, %v1549_v4, %v986_v20  ;;  %1177 = vmatpush.xpose.msrb.mxu0 %v1011_v33  ;;  %1390 = vmatpush.xpose.msra.mxu2 %v1011_v33  ;;  %vm973_vm1 = vweird.f32 %v1553_v12 }
 0x2e6   : > { %1554 = vrcp.f32 %v2148_v41  ;;  %1391 = vmatpush.xpose.msra.mxu3 %v1011_v33  ;;  %v995_v54 = vsel %vm992_vm0, %v994_v34, %v990_v13  ;;  %vm2162_vm4 = vmor %vm972_vm2, %vm973_vm1  ;;  %v960_v19 = vsel %vm959_vm6, %v2138_v58, %v956_v2  ;;  %v948_v16 = vand.u32 2147483648, %v2148_v41 }
 0x2e7   : > { %v969_v53 = vsub.f32 1.0, %v968_v62  ;;  %1556 = vrcp.f32 %v2150_v56  ;;  %v996_v38 = vmul.f32 %v2080_v60, %v995_v54  ;;  %v965_v7 = vsel %vm962_vm8, %v964_v50, %v960_v19 }
 0x2e8   : > { %vm942_vm10 = vweird.f32 %v2148_v41  ;;  %v946_v58 = vand.u32 2147483647, %v2148_v41  ;;  %v933_v6 = vand.u32 2147483648, %v2150_v56  ;;  %v966_v51 = vmul.f32 %v2082_v26, %v965_v7 }
 0x2e9   : > { %v970_v55 = vmul.f32 %v1553_v12, %v969_v53  ;;  %1178 = vmatpush.xpose.msrb.mxu0 %v996_v38  ;;  %1392 = vmatpush.xpose.msra.mxu2 %v996_v38  ;;  %v931_v21 = vand.u32 2147483647, %v2150_v56  ;;  %v949_v32 = vor.u32 1.1754944e-38, %v948_v16  ;;  %vm927_vm13 = vweird.f32 %v2150_v56 }
 0x2ea   : > { %1393 = vmatpush.xpose.msra.mxu3 %v996_v38  ;;  %vm947_vm14 = vcmp.eq.f32.partialorder %v946_v58, 8.507059e+37  ;;  %v934_v26 = vor.u32 1.1754944e-38, %v933_v6 }
 0x2eb   : > { %v971_v23 = vadd.f32 %v1553_v12, %v970_v55  ;;  %vm932_vm0 = vcmp.eq.f32.partialorder %v931_v21, 8.507059e+37 }
 0x2ec   : > { %v1555_v57 = vpop.eup %1554 }
 0x2ed   : > { %v2166_v45 = vpop.eup %1556  ;;  %v938_v29 = vmul.f32 %v1555_v57, %v2148_v41  ;;  %v2170_v40 = vpop.xlane.xlu1 %771  ;;  %v975_v15 = vsel %vm2162_vm4, %v1553_v12, %v971_v23  ;;  %vm943_vm9 = vweird.f32 %v1555_v57 }
 0x2ee   : > { %v2172_v63 = vpop.xlane.xlu0 %769  ;;  %v923_v39 = vmul.f32 %v2166_v45, %v2150_v56  ;;  %1558 = vrcp.f32 %v2170_v40  ;;  %v980_v4 = vsel %vm977_vm7, %v979_v25, %v975_v15  ;;  %vm2190_vm11 = vmor %vm942_vm10, %vm943_vm9  ;;  %vm928_vm12 = vweird.f32 %v2166_v45 }
 0x2ef   : > { %v939_v47 = vsub.f32 1.0, %v938_v29  ;;  %1560 = vrcp.f32 %v2172_v63  ;;  %v981_v61 = vmul.f32 %v2089_v1, %v980_v4  ;;  %vm929_vm15 = vmor %vm927_vm13, %vm928_vm12  ;;  %v918_v13 = vand.u32 2147483648, %v2170_v40 }
 0x2f0   : > { %v924_v48 = vsub.f32 1.0, %v923_v39  ;;  %vm912_vm2 = vweird.f32 %v2170_v40  ;;  %v903_v54 = vand.u32 2147483648, %v2172_v63  ;;  %v916_v55 = vand.u32 2147483647, %v2170_v40 }
 0x2f1   : > { %v940_v52 = vmul.f32 %v1555_v57, %v939_v47  ;;  %1179 = vmatpush.xpose.msrb.mxu0 %v981_v61  ;;  %1394 = vmatpush.xpose.msra.mxu2 %v981_v61  ;;  %v901_v43 = vand.u32 2147483647, %v2172_v63  ;;  %vm897_vm5 = vweird.f32 %v2172_v63 }
 0x2f2   : > { %v925_v44 = vmul.f32 %v2166_v45, %v924_v48  ;;  %1395 = vmatpush.xpose.msra.mxu3 %v981_v61  ;;  %v904_v0 = vor.u32 1.1754944e-38, %v903_v54  ;;  %vm917_vm6 = vcmp.eq.f32.partialorder %v916_v55, 8.507059e+37 }
 0x2f3   : > { %v941_v14 = vadd.f32 %v1555_v57, %v940_v52  ;;  %vm902_vm8 = vcmp.eq.f32.partialorder %v901_v43, 8.507059e+37 }
 0x2f4   : > { %v2187_v36 = vpop.eup %1558  ;;  %v926_v18 = vadd.f32 %v2166_v45, %v925_v44 }
 0x2f5   : > { %v2196_v17 = vpop.eup %1560  ;;  %v908_v42 = vmul.f32 %v2187_v36, %v2170_v40  ;;  %v2200_v59 = vpop.xlane.xlu1 %767  ;;  %v945_v24 = vsel %vm2190_vm11, %v1555_v57, %v941_v14  ;;  %1180 = vmatpush.xpose.msrb.mxu0 %v966_v51  ;;  %1396 = vmatpush.xpose.msra.mxu2 %v966_v51  ;;  %vm913_vm1 = vweird.f32 %v2187_v36  ;;  %v919_v40 = vor.u32 1.1754944e-38, %v918_v13 }
 0x2f6   : > { %v2203_v28 = vpop.xlane.xlu0 %765  ;;  %v893_v20 = vmul.f32 %v2196_v17, %v2172_v63  ;;  %1562 = vrcp.f32 %v2200_v59  ;;  %1397 = vmatpush.xpose.msra.mxu3 %v966_v51  ;;  %v950_v34 = vsel %vm947_vm14, %v949_v32, %v945_v24  ;;  %v930_v62 = vsel %vm929_vm15, %v2166_v45, %v926_v18  ;;  %vm2227_vm3 = vmor %vm912_vm2, %vm913_vm1 }
 0x2f7   : > { %v909_v12 = vsub.f32 1.0, %v908_v42  ;;  %1564 = vrcp.f32 %v2203_v28  ;;  %v951_v56 = vmul.f32 %v2095_v27, %v950_v34  ;;  %v935_v53 = vsel %vm932_vm0, %v934_v26, %v930_v62 }
 0x2f8   : > { %v894_v33 = vsub.f32 1.0, %v893_v20  ;;  %vm898_vm4 = vweird.f32 %v2196_v17  ;;  %v936_v60 = vmul.f32 %v2097_v8, %v935_v53  ;;  %v888_v48 = vand.u32 2147483648, %v2200_v59 }
 0x2f9   : > { %v910_v41 = vmul.f32 %v2187_v36, %v909_v12  ;;  %1181 = vmatpush.xpose.msrb.mxu0 %v951_v56  ;;  %1398 = vmatpush.xpose.msra.mxu2 %v951_v56  ;;  %vm899_vm7 = vmor %vm897_vm5, %vm898_vm4  ;;  %vm882_vm10 = vweird.f32 %v2200_v59  ;;  %v873_v52 = vand.u32 2147483648, %v2203_v28  ;;  %v886_v16 = vand.u32 2147483647, %v2200_v59 }
 0x2fa   : > { %v895_v11 = vmul.f32 %v2196_v17, %v894_v33  ;;  %1399 = vmatpush.xpose.msra.mxu3 %v951_v56  ;;  %v871_v14 = vand.u32 2147483647, %v2203_v28  ;;  %vm867_vm13 = vweird.f32 %v2203_v28 }
 0x2fb   : > { %v911_v38 = vadd.f32 %v2187_v36, %v910_v41  ;;  %vm887_vm14 = vcmp.eq.f32.partialorder %v886_v16, 8.507059e+37 }
 0x2fc   : > { %v2225_v30 = vpop.eup %1562  ;;  %v896_v23 = vadd.f32 %v2196_v17, %v895_v11  ;;  %vm872_vm0 = vcmp.eq.f32.partialorder %v871_v14, 8.507059e+37 }
 0x2fd   : > { %v2234_v2 = vpop.eup %1564  ;;  %v878_v57 = vmul.f32 %v2225_v30, %v2200_v59  ;;  %v2238_v35 = vpop.xlane.xlu1 %763  ;;  %v915_v29 = vsel %vm2227_vm3, %v2187_v36, %v911_v38  ;;  %1182 = vmatpush.xpose.msrb.mxu0 %v936_v60  ;;  %1400 = vmatpush.xpose.msra.mxu2 %v936_v60  ;;  %vm883_vm9 = vweird.f32 %v2225_v30  ;;  %v874_v59 = vor.u32 1.1754944e-38, %v873_v52 }
 0x2fe   : > { %v2241_v45 = vpop.xlane.xlu0 %761  ;;  %v863_v15 = vmul.f32 %v2234_v2, %v2203_v28  ;;  %1566 = vrcp.f32 %v2238_v35  ;;  %1401 = vmatpush.xpose.msra.mxu3 %v936_v60  ;;  %v920_v39 = vsel %vm917_vm6, %v919_v40, %v915_v29  ;;  %v900_v63 = vsel %vm899_vm7, %v2196_v17, %v896_v23  ;;  %vm2264_vm11 = vmor %vm882_vm10, %vm883_vm9 }
 0x2ff   : > { %v879_v25 = vsub.f32 1.0, %v878_v57  ;;  %1568 = vrcp.f32 %v2241_v45  ;;  %v921_v19 = vmul.f32 %v2103_v9, %v920_v39  ;;  %v905_v50 = vsel %vm902_vm8, %v904_v0, %v900_v63 }
 0x300   : > { %v864_v8 = vsub.f32 1.0, %v863_v15  ;;  %v906_v9 = vmul.f32 %v2105_v5, %v905_v50  ;;  %vm868_vm12 = vweird.f32 %v2234_v2  ;;  %v889_v17 = vor.u32 1.1754944e-38, %v888_v48 }
 0x301   : > { %v880_v47 = vmul.f32 %v2225_v30, %v879_v25  ;;  %1183 = vmatpush.xpose.msrb.mxu0 %v921_v19  ;;  %1402 = vmatpush.xpose.msra.mxu2 %v921_v19  ;;  %v858_v24 = vand.u32 2147483648, %v2238_v35  ;;  %vm869_vm15 = vmor %vm867_vm13, %vm868_vm12  ;;  %v856_v34 = vand.u32 2147483647, %v2238_v35  ;;  %vm852_vm2 = vweird.f32 %v2238_v35 }
 0x302   : > { %v865_v4 = vmul.f32 %v2234_v2, %v864_v8  ;;  %1403 = vmatpush.xpose.msra.mxu3 %v921_v19  ;;  %v843_v62 = vand.u32 2147483648, %v2241_v45  ;;  %v841_v27 = vand.u32 2147483647, %v2241_v45  ;;  %vm837_vm5 = vweird.f32 %v2241_v45 }
 0x303   : > { %v881_v61 = vadd.f32 %v2225_v30, %v880_v47  ;;  %v859_v13 = vor.u32 1.1754944e-38, %v858_v24  ;;  %vm857_vm6 = vcmp.eq.f32.partialorder %v856_v34, 8.507059e+37 }
 0x304   : > { %v1567_v44 = vpop.eup %1566  ;;  %v866_v5 = vadd.f32 %v2234_v2, %v865_v4  ;;  %v844_v43 = vor.u32 1.1754944e-38, %v843_v62  ;;  %vm842_vm8 = vcmp.eq.f32.partialorder %v841_v27, 8.507059e+37 }
 0x305   : > { %v2269_v58 = vpop.eup %1568  ;;  %v848_v36 = vmul.f32 %v1567_v44, %v2238_v35  ;;  %v885_v18 = vsel %vm2264_vm11, %v2225_v30, %v881_v61  ;;  %1184 = vmatpush.xpose.msrb.mxu0 %v906_v9  ;;  %1404 = vmatpush.xpose.msra.mxu2 %v906_v9  ;;  %vm853_vm1 = vweird.f32 %v1567_v44 }
 0x306   : > { %v2272_v6 = vpop.xlane.xlu1 %759  ;;  %v2274_v1 = vpop.xlane.xlu0 %757  ;;  %v833_v42 = vmul.f32 %v2269_v58, %v2241_v45  ;;  %1405 = vmatpush.xpose.msra.mxu3 %v906_v9  ;;  %v890_v32 = vsel %vm887_vm14, %v889_v17, %v885_v18  ;;  %v870_v12 = vsel %vm869_vm15, %v2234_v2, %v866_v5  ;;  %vm2295_vm3 = vmor %vm852_vm2, %vm853_vm1  ;;  %vm838_vm4 = vweird.f32 %v2269_v58  ;;  %v1576_v17 = vld [vmem:[%s1799_s18 + $0x8] sm:$0xff] }
 0x307   : > { %1570 = vrcp.f32 %v2272_v6  ;;  %v849_v51 = vsub.f32 1.0, %v848_v36  ;;  %v891_v20 = vmul.f32 %v2111_v22, %v890_v32  ;;  %v875_v33 = vsel %vm872_vm0, %v874_v59, %v870_v12  ;;  %vm839_vm7 = vmor %vm837_vm5, %vm838_vm4  ;;  %v1164_v18 = vpop.f32.mrf.mxu1  ;;  %v1578_v59 = vld [vmem:[%s1799_s18 + $0x10] sm:$0xff]  ;;  %v1580_v32 = vld [vmem:[%s1766_s29] sm:$0xff] }
 0x308   : > { %1572 = vrcp.f32 %v2274_v1  ;;  %v834_v21 = vsub.f32 1.0, %v833_v42  ;;  %v876_v55 = vmul.f32 %v2113_v10, %v875_v33  ;;  %v828_v10 = vand.u32 2147483648, %v2272_v6  ;;  %v1577_v42 = vld [vmem:[%s1799_s18] sm:$0xff] }
 0x309   : > { %v850_v28 = vmul.f32 %v1567_v44, %v849_v51  ;;  %1185 = vmatpush.xpose.msrb.mxu0 %v891_v20  ;;  %1406 = vmatpush.xpose.msra.mxu2 %v891_v20  ;;  %v826_v40 = vand.u32 2147483647, %v2272_v6  ;;  %vm822_vm10 = vweird.f32 %v2272_v6  ;;  %vm807_vm11 = vweird.f32 %v2274_v1 }
 0x30a   : > { %v835_v26 = vmul.f32 %v2269_v58, %v834_v21  ;;  %1407 = vmatpush.xpose.msra.mxu3 %v891_v20  ;;  %v829_v39 = vor.u32 1.1754944e-38, %v828_v10  ;;  %v811_v63 = vand.u32 2147483647, %v2274_v1  ;;  %v813_v47 = vand.u32 2147483648, %v2274_v1 }
 0x30b   : > { %v851_v41 = vadd.f32 %v1567_v44, %v850_v28  ;;  %vm827_vm14 = vcmp.eq.f32.partialorder %v826_v40, 8.507059e+37 }
 0x30c   : > { %v836_v11 = vadd.f32 %v2269_v58, %v835_v26  ;;  %vm812_vm0 = vcmp.eq.f32.partialorder %v811_v63, 8.507059e+37  ;;  %v1581_v26 = vld [vmem:[%s1766_s29 + $0x8] sm:$0xff] }
 0x30d   : > { %v1571_v56 = vpop.eup %1570  ;;  %v855_v30 = vsel %vm2295_vm3, %v1567_v44, %v851_v41  ;;  %1186 = vmatpush.xpose.msrb.mxu0 %v876_v55  ;;  %1408 = vmatpush.xpose.msra.mxu2 %v876_v55  ;;  %v814_v44 = vor.u32 1.1754944e-38, %v813_v47 }
 0x30e   : > { %v1573_v53 = vpop.eup %1572  ;;  %v818_v54 = vmul.f32 %v1571_v56, %v2272_v6  ;;  %v2302_v38 = vpop.xlane.xlu1 %755  ;;  %v860_v57 = vsel %vm857_vm6, %v859_v13, %v855_v30  ;;  %1409 = vmatpush.xpose.msra.mxu3 %v876_v55  ;;  %v840_v45 = vsel %vm839_vm7, %v2269_v58, %v836_v11  ;;  %vm823_vm9 = vweird.f32 %v1571_v56 }
 0x30f   : > { %v803_v23 = vmul.f32 %v1573_v53, %v2274_v1  ;;  %1574 = vrcp.f32 %v2302_v38  ;;  %v861_v60 = vmul.f32 %v2119_v49, %v860_v57  ;;  %v845_v0 = vsel %vm842_vm8, %v844_v43, %v840_v45  ;;  %vm824_vm13 = vmor %vm822_vm10, %vm823_vm9 }
 0x310   : > { %v819_v2 = vsub.f32 1.0, %v818_v54  ;;  %vm808_vm12 = vweird.f32 %v1573_v53  ;;  %v846_v50 = vmul.f32 %v2121_v37, %v845_v0  ;;  %v798_v9 = vand.u32 2147483648, %v2302_v38  ;;  %v1583_v54 = vld [vmem:[%s1766_s29 + $0x18] sm:$0xff] }
 0x311   : > { %v804_v35 = vsub.f32 1.0, %v803_v23  ;;  %1187 = vmatpush.xpose.msrb.mxu0 %v861_v60  ;;  %1410 = vmatpush.xpose.msra.mxu2 %v861_v60  ;;  %vm809_vm15 = vmor %vm807_vm11, %vm808_vm12  ;;  %v796_v37 = vand.u32 2147483647, %v2302_v38  ;;  %vm792_vm2 = vweird.f32 %v2302_v38 }
 0x312   : > { %v820_v29 = vmul.f32 %v1571_v56, %v819_v2  ;;  %1411 = vmatpush.xpose.msra.mxu3 %v861_v60  ;;  %v799_v36 = vor.u32 1.1754944e-38, %v798_v9 }
 0x313   : > { %v805_v15 = vmul.f32 %v1573_v53, %v804_v35  ;;  %vm797_vm4 = vcmp.eq.f32.partialorder %v796_v37, 8.507059e+37 }
 0x314   : > { %v821_v25 = vadd.f32 %v1571_v56, %v820_v29 }
 0x315   : > { %v1575_v8 = vpop.eup %1574  ;;  %v806_v49 = vadd.f32 %v1573_v53, %v805_v15  ;;  %1188 = vmatpush.xpose.msrb.mxu0 %v846_v50  ;;  %1412 = vmatpush.xpose.msra.mxu2 %v846_v50 }
 0x316   : > { %v788_v19 = vmul.f32 %v1575_v8, %v2302_v38  ;;  %v825_v48 = vsel %vm824_vm13, %v1571_v56, %v821_v25  ;;  %1413 = vmatpush.xpose.msra.mxu3 %v846_v50  ;;  %vm793_vm1 = vweird.f32 %v1575_v8  ;;  %v1582_v56 = vld [vmem:[%s1766_s29 + $0x10] sm:$0xff] }
 0x317   : > { %v830_v4 = vsel %vm827_vm14, %v829_v39, %v825_v48  ;;  %v810_v16 = vsel %vm809_vm15, %v1573_v53, %v806_v49  ;;  %vm794_vm3 = vmor %vm792_vm2, %vm793_vm1 }
 0x318   : > { %v789_v52 = vsub.f32 1.0, %v788_v19  ;;  %v831_v61 = vmul.f32 %v2128_v46, %v830_v4  ;;  %v815_v14 = vsel %vm812_vm0, %v814_v44, %v810_v16 }
 0x319   : > { %v816_v46 = vmul.f32 %v2126_v31, %v815_v14  ;;  %v1167_v31 = vpop.f32.mrf.mxu1 }
 0x31a   : > { %v790_v7 = vmul.f32 %v1575_v8, %v789_v52  ;;  %1189 = vmatpush.xpose.msrb.mxu0 %v831_v61  ;;  %1414 = vmatpush.xpose.msra.mxu2 %v831_v61 }
 0x31b   : > { %1415 = vmatpush.xpose.msra.mxu3 %v831_v61 }
 0x31c   : > { %v791_v58 = vadd.f32 %v1575_v8, %v790_v7 }
 0x31e   : > { %v795_v6 = vsel %vm794_vm3, %v1575_v8, %v791_v58  ;;  %1190 = vmatpush.xpose.msrb.mxu0 %v816_v46  ;;  %1416 = vmatpush.xpose.msra.mxu2 %v816_v46 }
 0x31f   : > { %v800_v1 = vsel %vm797_vm4, %v799_v36, %v795_v6  ;;  %1417 = vmatpush.xpose.msra.mxu3 %v816_v46 }
 0x320   : > { %v801_v5 = vmul.f32 %v2132_v3, %v800_v1  ;;  %v1579_v3 = vld [vmem:[%s1799_s18 + $0x18] sm:$0xff]  ;;  %s1238_s18 = scalar_lea.sflag [#allocation4], %s284_s14 }
 0x321   : > { %v1170_v51 = vpop.f32.mrf.mxu1 }
 0x322   : > { %1191 = vmatpush.xpose.msrb.mxu0 %v801_v5  ;;  %1418 = vmatpush.xpose.msra.mxu2 %v801_v5 }
 0x323   : > { %1419 = vmatpush.xpose.msra.mxu3 %v801_v5 }
 0x325   : > { %1195 = vmatmul.f32.vlgmr.msra.gmra.mxu2 %v1576_v17  ;;  %1192 = vmatmul.f32.vlgmr.msrb.gmra.mxu0 %v1577_v42 }
 0x326   : > { %1204 = vmatmul.f32.vlgmr.msra.gmra.mxu3 %v1164_v18 }
 0x329   : > { %v1173_v24 = vpop.f32.mrf.mxu1 }
 0x32d   : > { %1198 = vmatmul.f32.gmra.mxu2 %v1578_v59 }
 0x32e   : > { %1207 = vmatmul.f32.gmra.mxu3 %v1167_v31 }
 0x335   : > { %1201 = vmatmul.f32.gmra.mxu2 %v1579_v3 }
 0x336   : > { %1210 = vmatmul.f32.gmra.mxu3 %v1170_v51 }
 0x33e   : > { %1213 = vmatmul.f32.gmra.mxu3 %v1173_v24 }
 0x3a2   : > { %v1193_v21 = vpop.f32.mrf.mxu0 }
 0x3a3   : > { %1217 = vst [vmem:[%s1766_s29 + $0x20] sm:$0xff] %v1193_v21  ;;  %v1221_v28 = vmul.f32 %v1580_v32, %v1193_v21 }
 0x3a5   : > { %1225 = vst [vmem:[%s1766_s29 + $0x40] sm:$0xff] %v1221_v28 }
 0x3a8   : > { %v1196_v20 = vpop.f32.mrf.mxu2 }
 0x3a9   : > { %v1205_v12 = vpop.f32.mrf.mxu3  ;;  %1218 = vst [vmem:[%s1766_s29 + $0x28] sm:$0xff] %v1196_v20  ;;  %v1222_v33 = vmul.f32 %v1581_v26, %v1196_v20 }
 0x3aa   : > { %v1229_v34 = vmul.f32 %v1580_v32, %v1205_v12 }
 0x3ab   : > { %1226 = vst [vmem:[%s1766_s29 + $0x48] sm:$0xff] %v1222_v33 }
 0x3ac   : > { %1233 = vst [vmem:[%s1766_s29 + $0x60] sm:$0xff] %v1229_v34 }
 0x3b0   : > { %v1199_v62 = vpop.f32.mrf.mxu2 }
 0x3b1   : > { %v1208_v41 = vpop.f32.mrf.mxu3  ;;  %1219 = vst [vmem:[%s1766_s29 + $0x30] sm:$0xff] %v1199_v62  ;;  %v1223_v13 = vmul.f32 %v1582_v56, %v1199_v62 }
 0x3b2   : > { %v1230_v22 = vmul.f32 %v1581_v26, %v1208_v41 }
 0x3b3   : > { %1227 = vst [vmem:[%s1766_s29 + $0x50] sm:$0xff] %v1223_v13 }
 0x3b4   : > { %1234 = vst [vmem:[%s1766_s29 + $0x68] sm:$0xff] %v1230_v22 }
 0x3b8   : > { %v1202_v11 = vpop.f32.mrf.mxu2 }
 0x3b9   : > { %v1211_v53 = vpop.f32.mrf.mxu3  ;;  %1220 = vst [vmem:[%s1766_s29 + $0x38] sm:$0xff] %v1202_v11  ;;  %v1224_v38 = vmul.f32 %v1583_v54, %v1202_v11 }
 0x3ba   : > { %v1231_v55 = vmul.f32 %v1582_v56, %v1211_v53 }
 0x3bb   : > { %1228 = vst [vmem:[%s1766_s29 + $0x58] sm:$0xff] %v1224_v38 }
 0x3bc   : > { %1235 = vst [vmem:[%s1766_s29 + $0x70] sm:$0xff] %v1231_v55 }
 0x3c1   : > { %v1214_v30 = vpop.f32.mrf.mxu3 }
 0x3c2   : > { %v1232_v27 = vmul.f32 %v1583_v54, %v1214_v30 }
 0x3c4   : > { %1236 = vst [vmem:[%s1766_s29 + $0x78] sm:$0xff] %v1232_v27 }
 0x3c5   : > { %1611 = shalt.err (!%p1608_p3)
}
 0x3c6   : > { %s1651_s14 = smov 128   ;;  %s1652_s29 = smov 8  }
 0x3c7   : > { %1420 = dma.vmem_to_hbm [thread:$0]  (%p1729_p5), %s1251_s13, 2048, %s1253_s16, %s1238_s18, %s1651_s14, %s1651_s14, %s1652_s29  }
 0x3c8 PF: > { %p1426_p4 = scmp.ge.s32.totalorder %s1646_s26, 2  ;;  %s1267_s10 = sand.u32 1, %s1634_s23  }
 0x3c9   : > { %s1268_s15 = scalar_lea.sflag [#allocation4], %s1267_s10 }
 0x3ca   : > { %p1423_p7 = pnand %p1426_p4, %p1733_p6 }
 0x3cc   : > { %p1424_p8 = pneg %p1423_p7 }
 0x3ce   : > { %1629 = dma.done.wait (%p1424_p8), %s1268_s15, 2048  }
 0x3cf   : > { %1631 = vsyncadd (%p1424_p8), %s1268_s15, 4294965248  ;;  %p17_p9 = scmp.ge.s32.totalorder %s1716_s28, 4   ;;  %s2406_s23 = smov %s1638_s24 }
 0x3d0   : > { %s2407_s24 = smov %s1642_s25  ;;  %s2408_s25 = smov %s1727_s7 }
 0x3d1   : > { %s2409_s26 = smov %s1716_s28  ;;  %19 = sbr.rel (!%p17_p9) target bundleno = 5 (0x5), region = 88 }
 0x3d6   :  { %1274 = vsyncpa [#allocation4], 1 }
 0x3d7   :  { %1276 = vsyncpa [#allocation4 + $0x1], 1 }

</bundles_post_ra>
